<compile_context>
chip_gen: v6e
topology: v6e:2x2x1
jax: 0.10.0
libtpu: 0.0.40
codegen_flags: <defaults>
</compile_context>

<pallas_src>
import jax
import jax.numpy as jnp
from jax.experimental import pallas as pl
from jax.experimental.pallas import tpu as pltpu


def _decoder_kernel(z_ref, w1_ref, b1_ref, w2_ref, b2_ref, out_ref):
    # Layer 1: bf16 MXU matmul with f32 accumulation; bias + ReLU in f32.
    h = jnp.dot(z_ref[...], w1_ref[...], preferred_element_type=jnp.float32)
    h = jnp.maximum(h + b1_ref[...], 0.0)          # b1 is (1, 512) -> row bcast

    # Layer 2: cast activations back to bf16 for the MXU, accumulate in f32.
    y = jnp.dot(h.astype(jnp.bfloat16), w2_ref[...],
                preferred_element_type=jnp.float32)
    y = y + b2_ref[...]                            # b2 is (1, 1200)

    # sigmoid(y) = 0.5 + 0.5 * tanh(0.5 * y): one EUP op, overflow-free.
    out_ref[...] = (0.5 + 0.5 * jnp.tanh(0.5 * y)).astype(out_ref.dtype)


def _round_up(x, m):
    return ((x + m - 1) // m) * m


def decoder_forward(z, w1, b1, w2, b2, *, block_rows=1024,
                    out_dtype=jnp.float32):
    """z: (B, latent). w1: (512, latent), b1: (512,), w2: (1200, 512), b2: (1200,).

    Returns (B // 100, 1, 100, 1200) in `out_dtype`, matching the PyTorch
    module (pass out_dtype=jnp.bfloat16 on writeback-bound chips if the
    consumer tolerates it).
    """
    B, latent = z.shape
    assert B % 100 == 0, "reshape((-1, 1, 100, 1200)) needs batch % 100 == 0"

    # Row tiling: round batch to 16 (bf16 sublane packing), then split into
    # evenly sized tiles.  Use at least 2 tiles when the batch allows it so
    # the grid is megacore-shardable (v7x) and the DMA pipeline has >1 step.
    # Padding is at most (tb - 1) rows, vs. up to block_rows - 1 previously.
    b16 = _round_up(B, 16)
    min_tiles = 2 if b16 >= 32 else 1
    n_tiles_target = max(pl.cdiv(b16, block_rows), min_tiles)
    tb = _round_up(pl.cdiv(b16, n_tiles_target), 16)
    n_tiles = pl.cdiv(b16, tb)
    b_pad = n_tiles * tb

    z_p = z if b_pad == B else jnp.pad(z, ((0, b_pad - B), (0, 0)))

    # Glue: PyTorch (out, in) weights -> (in, out); bf16 MXU operands; biases
    # as f32 (1, N) rows for lane-wise broadcast inside the kernel.
    z_bf = z_p.astype(jnp.bfloat16)
    w1_t = w1.T.astype(jnp.bfloat16)               # (latent, 512)
    w2_t = w2.T.astype(jnp.bfloat16)               # (512, 1200)
    b1_r = b1.reshape(1, -1).astype(jnp.float32)   # (1, 512)
    b2_r = b2.reshape(1, -1).astype(jnp.float32)   # (1, 1200)

    out_bytes = jnp.dtype(out_dtype).itemsize
    cost = pl.CostEstimate(
        flops=2 * b_pad * (latent * 512 + 512 * 1200),
        transcendentals=b_pad * 1200,               # one tanh per output elem
        bytes_accessed=(z_bf.size * 2 + w1_t.size * 2 + w2_t.size * 2
                        + b1_r.size * 4 + b2_r.size * 4
                        + b_pad * 1200 * out_bytes),
    )

    # Weights / biases are grid-invariant -> single-buffered, stay resident.
    resident = dict(pipeline_mode=pl.Buffered(1))

    out = pl.pallas_call(
        _decoder_kernel,
        out_shape=jax.ShapeDtypeStruct((b_pad, 1200), out_dtype),
        grid_spec=pl.GridSpec(
            grid=(n_tiles,),
            in_specs=[
                pl.BlockSpec((tb, latent), lambda i: (i, 0)),            # z tile
                pl.BlockSpec((latent, 512), lambda i: (0, 0), **resident),  # W1
                pl.BlockSpec((1, 512), lambda i: (0, 0), **resident),       # b1
                pl.BlockSpec((512, 1200), lambda i: (0, 0), **resident),    # W2
                pl.BlockSpec((1, 1200), lambda i: (0, 0), **resident),      # b2
            ],
            out_specs=pl.BlockSpec((tb, 1200), lambda i: (i, 0)),
        ),
        compiler_params=pltpu.CompilerParams(
            dimension_semantics=("parallel",),      # megacore-shardable on v7x
            vmem_limit_bytes=48 * 1024 * 1024,      # < 64 MiB physical on v7x
        ),
        cost_estimate=cost,
    )(z_bf, w1_t, b1_r, w2_t, b2_r)

    if b_pad != B:
        out = out[:B]          # tiny (<= tb-1 rows of pad) thanks to even tiling
    return out.reshape(-1, 1, 100, 1200)


if __name__ == "__main__":
    latent_dims = 32
    batch = 100  # the module's reshape((-1, 1, 100, 1200)) requires batch % 100 == 0

    key = jax.random.PRNGKey(0)
    k_z, k_w1, k_b1, k_w2, k_b2 = jax.random.split(key, 5)

    # Deterministic synthetic parameters (PyTorch nn.Linear weight layout: (out, in)).
    z = jax.random.normal(k_z, (batch, latent_dims), dtype=jnp.float32)
    w1 = jax.random.normal(k_w1, (512, latent_dims), dtype=jnp.float32) * 0.05
    b1 = jax.random.normal(k_b1, (512,), dtype=jnp.float32) * 0.05
    w2 = jax.random.normal(k_w2, (1200, 512), dtype=jnp.float32) * 0.05
    b2 = jax.random.normal(k_b2, (1200,), dtype=jnp.float32) * 0.05

    out = decoder_forward(z, w1, b1, w2, b2)
    jax.block_until_ready(out)

    # Pure-JAX f32 reference. Kernel uses bf16 MXU operands, so tolerance is
    # loosened accordingly (sigmoid output is in [0, 1]).
    ref = jax.nn.sigmoid(
        jnp.maximum(z @ w1.T + b1, 0.0) @ w2.T + b2
    ).reshape(-1, 1, 100, 1200)
    assert out.shape == (batch // 100, 1, 100, 1200)
    assert jnp.allclose(out, ref, atol=2e-2, rtol=0.0), float(
        jnp.max(jnp.abs(out - ref)))

    print("KERNEL_OK")
</pallas_src>

<mosaic_0001>
module attributes {stable_mosaic.version = 11 : i64} {
  func.func @_decoder_kernel(%arg0: i32, %arg1: memref<64x32xbf16, #tpu.memory_space<vmem>>, %arg2: memref<32x512xbf16, #tpu.memory_space<vmem>>, %arg3: memref<1x512xf32, #tpu.memory_space<vmem>>, %arg4: memref<512x1200xbf16, #tpu.memory_space<vmem>>, %arg5: memref<1x1200xf32, #tpu.memory_space<vmem>>, %arg6: memref<64x1200xf32, #tpu.memory_space<vmem>>) attributes {dimension_semantics = [#tpu.dimension_semantics<parallel>], iteration_bounds = array<i64: 2>, scalar_prefetch = 0 : i64, scratch_operands = 0 : i64, tpu.core_type = #tpu.core_type<tc>, window_params = [{transform_indices = @transform_0, window_bounds = array<i64: 64, 32>}, {pipeline_mode = #tpu.pipeline_mode<synchronous>, transform_indices = @transform_1, window_bounds = array<i64: 32, 512>}, {pipeline_mode = #tpu.pipeline_mode<synchronous>, transform_indices = @transform_2, window_bounds = array<i64: 1, 512>}, {pipeline_mode = #tpu.pipeline_mode<synchronous>, transform_indices = @transform_3, window_bounds = array<i64: 512, 1200>}, {pipeline_mode = #tpu.pipeline_mode<synchronous>, transform_indices = @transform_4, window_bounds = array<i64: 1, 1200>}, {transform_indices = @transform_5, window_bounds = array<i64: 64, 1200>}]} {
    %c0 = arith.constant 0 : index
    %c0_0 = arith.constant 0 : index
    %0 = vector.load %arg1[%c0, %c0_0] : memref<64x32xbf16, #tpu.memory_space<vmem>>, vector<64x32xbf16>
    %c0_1 = arith.constant 0 : index
    %c0_2 = arith.constant 0 : index
    %1 = vector.load %arg2[%c0_1, %c0_2] : memref<32x512xbf16, #tpu.memory_space<vmem>>, vector<32x512xbf16>
    %cst = arith.constant dense<0.000000e+00> : vector<64x512xf32>
    %2 = tpu.matmul %0, %1, %cst {dimension_numbers = #tpu.dot_dimension_numbers<[1], [0], [0], [1], [0, 0, 1, 1], [], []>} : vector<64x32xbf16>, vector<32x512xbf16>, vector<64x512xf32> -> vector<64x512xf32>
    %c0_3 = arith.constant 0 : index
    %c0_4 = arith.constant 0 : index
    %3 = vector.load %arg3[%c0_3, %c0_4] : memref<1x512xf32, #tpu.memory_space<vmem>>, vector<1x512xf32>
    %4 = vector.broadcast %3 : vector<1x512xf32> to vector<64x512xf32>
    %5 = arith.addf %2, %4 : vector<64x512xf32>
    %cst_5 = arith.constant 0.000000e+00 : f32
    %6 = vector.broadcast %cst_5 : f32 to vector<64x512xf32>
    %7 = arith.maximumf %5, %6 : vector<64x512xf32>
    %8 = arith.truncf %7 : vector<64x512xf32> to vector<64x512xbf16>
    %c0_6 = arith.constant 0 : index
    %c0_7 = arith.constant 0 : index
    %9 = vector.load %arg4[%c0_6, %c0_7] : memref<512x1200xbf16, #tpu.memory_space<vmem>>, vector<512x1200xbf16>
    %cst_8 = arith.constant dense<0.000000e+00> : vector<64x1200xf32>
    %10 = tpu.matmul %8, %9, %cst_8 {dimension_numbers = #tpu.dot_dimension_numbers<[1], [0], [0], [1], [0, 0, 1, 1], [], []>} : vector<64x512xbf16>, vector<512x1200xbf16>, vector<64x1200xf32> -> vector<64x1200xf32>
    %c0_9 = arith.constant 0 : index
    %c0_10 = arith.constant 0 : index
    %11 = vector.load %arg5[%c0_9, %c0_10] : memref<1x1200xf32, #tpu.memory_space<vmem>>, vector<1x1200xf32>
    %12 = vector.broadcast %11 : vector<1x1200xf32> to vector<64x1200xf32>
    %13 = arith.addf %10, %12 : vector<64x1200xf32>
    %cst_11 = arith.constant 5.000000e-01 : f32
    %14 = vector.broadcast %cst_11 : f32 to vector<64x1200xf32>
    %15 = arith.mulf %14, %13 : vector<64x1200xf32>
    %16 = math.tanh %15 : vector<64x1200xf32>
    %cst_12 = arith.constant 5.000000e-01 : f32
    %17 = vector.broadcast %cst_12 : f32 to vector<64x1200xf32>
    %18 = arith.mulf %17, %16 : vector<64x1200xf32>
    %cst_13 = arith.constant 5.000000e-01 : f32
    %19 = vector.broadcast %cst_13 : f32 to vector<64x1200xf32>
    %20 = arith.addf %19, %18 : vector<64x1200xf32>
    %c0_14 = arith.constant 0 : index
    %c0_15 = arith.constant 0 : index
    %21 = vector.load %arg6[%c0_14, %c0_15] : memref<64x1200xf32, #tpu.memory_space<vmem>>, vector<64x1200xf32>
    tpu.vector_store %arg6[%c0_14, %c0_15], %20 {strides = array<i32>} : memref<64x1200xf32, #tpu.memory_space<vmem>>, vector<64x1200xf32>,
    return
  }
  func.func @transform_0(%arg0: i32) -> (i32, i32) {
    %c0_i32 = arith.constant 0 : i32
    %c0_i32_0 = arith.constant 0 : i32
    return %arg0, %c0_i32 : i32, i32
  }
  func.func @transform_1(%arg0: i32) -> (i32, i32) {
    %c0_i32 = arith.constant 0 : i32
    %c0_i32_0 = arith.constant 0 : i32
    %c0_i32_1 = arith.constant 0 : i32
    return %c0_i32, %c0_i32_0 : i32, i32
  }
  func.func @transform_2(%arg0: i32) -> (i32, i32) {
    %c0_i32 = arith.constant 0 : i32
    %c0_i32_0 = arith.constant 0 : i32
    %c0_i32_1 = arith.constant 0 : i32
    return %c0_i32, %c0_i32_0 : i32, i32
  }
  func.func @transform_3(%arg0: i32) -> (i32, i32) {
    %c0_i32 = arith.constant 0 : i32
    %c0_i32_0 = arith.constant 0 : i32
    %c0_i32_1 = arith.constant 0 : i32
    return %c0_i32, %c0_i32_0 : i32, i32
  }
  func.func @transform_4(%arg0: i32) -> (i32, i32) {
    %c0_i32 = arith.constant 0 : i32
    %c0_i32_0 = arith.constant 0 : i32
    %c0_i32_1 = arith.constant 0 : i32
    return %c0_i32, %c0_i32_0 : i32, i32
  }
  func.func @transform_5(%arg0: i32) -> (i32, i32) {
    %c0_i32 = arith.constant 0 : i32
    %c0_i32_0 = arith.constant 0 : i32
    return %arg0, %c0_i32 : i32, i32
  }
}

</mosaic_0001>

<bundles_post_ra>
// kernel: tpu_custom_call.1
= control target key start
LH: loop header
LB: loop body
LE: loop exit
PB: predicated region body
PF: predicated region fallthrough
CT: control target
= control target key end

     0   :  { %s4756_s18 = smov 0   ;;  %s6173_s0 = inlined_call_operand.vmem [shape: bf16[128,32], index: 0, kind: input, shape index: {}]   ;;  %s6174_s1 = inlined_call_operand.vmem [shape: bf16[32,512], index: 1, kind: input, shape index: {}]   ;;  %s6175_s2 = inlined_call_operand.vmem [shape: f32[1,512], index: 2, kind: input, shape index: {}]   ;;  %s6176_s3 = inlined_call_operand.vmem [shape: bf16[512,1200], index: 3, kind: input, shape index: {}]   ;;  %s6177_s4 = inlined_call_operand.vmem [shape: f32[1,1200], index: 4, kind: input, shape index: {}]   ;;  %s6178_s5 = inlined_call_operand.vmem [shape: f32[128,1200], index: 5, kind: output, shape index: {}]  }
   0x1 LB: > { %s3699_s19 = sadd.s32 4294967295, %s4723_s18   ;;  %p3703_p0 = scmp.ge.s32.totalorder %s4723_s18, 1  ;;  %s4723_s18 = sphi %s4756_s18, %s15_s18  }
   0x2   : > { %p188_p1 = scmp.lt.s32.totalorder %s4723_s18, 3 }
   0x4   : > { %p189_p2 = pnand %p3703_p0, %p188_p1 }
   0x5   : > { %s3704_s22 = sshll.u32 (!%p189_p2), %s3699_s19, 3 }
   0x6   : > { %192 = sbr.rel (%p189_p2) target bundleno = 735 (0x2df), region = 40  ;;  %p218_p3 = scmp.lt.s32.totalorder (!%p189_p2), %s3704_s22, 15 }
   0xb   : > { %v4060_v0 = vld [vmem:[%s6174_s1 + $0x24] ss:$16 sps:$4 sm:$0xff]   ;;  %v4062_v1 = vld [vmem:[%s6174_s1 + $0x2c] ss:$16 sps:$4 sm:$0xff]   ;;  %v4725_v2 = vmov 0   ;;  %s6180_s22 = smov (!%p218_p3, %s3704_s22), 15 }
   0xc   : > { %374 = vmatprep.mubr.bf16.mxu0 %v4725_v2  ;;  %447 = vmatprep.mubr.bf16.mxu1 %v4725_v2  ;;  %v4064_v3 = vld [vmem:[%s6174_s1 + $0x20] ss:$16 sps:$4 sm:$0xff]   ;;  %v4065_v4 = vld [vmem:[%s6174_s1 + $0x28] ss:$16 sps:$4 sm:$0xff]   ;;  %v4066_v5 = vld [vmem:[%s6174_s1 + $0x4] ss:$16 sps:$4 sm:$0xff]  }
   0xd   : > { %354 = vmatprep.subr.bf16.mxu0 %v4060_v0  ;;  %427 = vmatprep.subr.bf16.mxu1 %v4062_v1  ;;  %v4068_v6 = vld [vmem:[%s6174_s1 + $0xc] ss:$16 sps:$4 sm:$0xff]   ;;  %v4070_v7 = vld [vmem:[%s6174_s1] ss:$16 sps:$4 sm:$0xff]   ;;  %v4071_v8 = vld [vmem:[%s6174_s1 + $0x8] ss:$16 sps:$4 sm:$0xff]  }
   0xe   : > { %355 = vmatpush1.bf16.msra.mxu0 %v4064_v3  ;;  %428 = vmatpush1.bf16.msra.mxu1 %v4065_v4  ;;  %s3705_s12 = sshll.u32 %s6180_s22, 2  ;;  %v4078_v9 = vld [vmem:[%s6176_s3 + $0x234] ss:$40 sps:$4 sm:$0xff]   ;;  %vm329_vm0 = vcmask 261120   ;;  %v4076_v11 = vld [vmem:[%s6176_s3 + $0x230] ss:$40 sps:$4 sm:$0xff]  }
   0xf   : > { %356 = vmatprep.subr.bf16.mxu0 %v4066_v5  ;;  %429 = vmatprep.subr.bf16.mxu1 %v4068_v6  ;;  %s4796_s15 = scalar_lea.vmem %s6173_s0, %s3705_s12  ;;  %v4079_v12 = vld [vmem:[%s6176_s3 + $0x730] ss:$40 sps:$4 sm:$0xff]   ;;  %v4081_v13 = vld [vmem:[%s6176_s3 + $0x734] ss:$40 sps:$4 sm:$0xff]   ;;  %v4082_v14 = vld [vmem:[%s6176_s3 + $0x1e0] ss:$40 sps:$4 sm:$0xff]  }
  0x10   : > { %v4072_v10 = vld [vmem:[%s4796_s15] sm:$0xff]   ;;  %v4073_v18 = vld [vmem:[%s4796_s15 + $0x8] sm:$0xff]   ;;  %v4090_v19 = vld [vmem:[%s6176_s3 + $0x194] ss:$40 sps:$4 sm:$0xff]   ;;  %s4050_s26 = smul.u32 80, %s6180_s22  ;;  %vm3569_vm1 = vcmask 392192  }
  0x11   : > { %v4084_v15 = vld [vmem:[%s6176_s3 + $0x1e4] ss:$40 sps:$4 sm:$0xff]   ;;  %v4085_v16 = vld [vmem:[%s6176_s3 + $0x6e0] ss:$40 sps:$4 sm:$0xff]   ;;  %v4088_v20 = vld [vmem:[%s6176_s3 + $0x190] ss:$40 sps:$4 sm:$0xff]  }
  0x12   : > { %357 = vmatpush1.bf16.msra.mxu0 %v4070_v7  ;;  %430 = vmatpush1.bf16.msra.mxu1 %v4071_v8  ;;  %v4087_v17 = vld [vmem:[%s6176_s3 + $0x6e4] ss:$40 sps:$4 sm:$0xff]   ;;  %v4093_v21 = vld [vmem:[%s6176_s3 + $0x694] ss:$40 sps:$4 sm:$0xff]   ;;  %v4091_v22 = vld [vmem:[%s6176_s3 + $0x690] ss:$40 sps:$4 sm:$0xff]   ;;  %s5840_s10 = scalar_lea.vmem %s6178_s5, %s4050_s26 }
  0x13   : > { %2510 = vmatprep.subr.bf16.mxu0 %v4078_v9  ;;  %2583 = vmatprep.subr.bf16.mxu1 %v4081_v13  ;;  %v4096_v23 = vld [vmem:[%s6176_s3 + $0x144] ss:$40 sps:$4 sm:$0xff]   ;;  %v4094_v25 = vld [vmem:[%s6176_s3 + $0x140] ss:$40 sps:$4 sm:$0xff]   ;;  %v4102_v27 = vld [vmem:[%s6176_s3 + $0xf4] ss:$40 sps:$4 sm:$0xff]  }
  0x14   : > { %v4099_v24 = vld [vmem:[%s6176_s3 + $0x644] ss:$40 sps:$4 sm:$0xff]   ;;  %v4097_v26 = vld [vmem:[%s6176_s3 + $0x640] ss:$40 sps:$4 sm:$0xff]   ;;  %v4074_v28 = vld [vmem:[%s4796_s15 + $0x10] sm:$0xff]  }
  0x15   : > { %3720 = vmatmul.mubr.msk.bf16.vlgmr.msra.gmra.mxu0 %vm329_vm0, %v4072_v10  ;;  %3724 = vmatmul.mubr.msk.bf16.vlgmr.msra.gmra.mxu1 %vm329_vm0, %v4072_v10  ;;  %v4100_v29 = vld [vmem:[%s6176_s3 + $0xf0] ss:$40 sps:$4 sm:$0xff]   ;;  %v4105_v30 = vld [vmem:[%s6176_s3 + $0x5f4] ss:$40 sps:$4 sm:$0xff]   ;;  %v4108_v32 = vld [vmem:[%s6176_s3 + $0xa4] ss:$40 sps:$4 sm:$0xff]  }
  0x16   : > { %384 = vmatprep.mubr.bf16.mxu0 %v4725_v2  ;;  %457 = vmatprep.mubr.bf16.mxu1 %v4725_v2  ;;  %v4103_v31 = vld [vmem:[%s6176_s3 + $0x5f0] ss:$40 sps:$4 sm:$0xff]   ;;  %v4111_v33 = vld [vmem:[%s6176_s3 + $0x5a4] ss:$40 sps:$4 sm:$0xff]   ;;  %v4106_v34 = vld [vmem:[%s6176_s3 + $0xa0] ss:$40 sps:$4 sm:$0xff]  }
  0x17   : > { %2511 = vmatpush1.bf16.msra.mxu0 %v4076_v11  ;;  %2584 = vmatpush1.bf16.msra.mxu1 %v4079_v12  ;;  %v4109_v35 = vld [vmem:[%s6176_s3 + $0x5a0] ss:$40 sps:$4 sm:$0xff]   ;;  %v4114_v36 = vld [vmem:[%s6176_s3 + $0x54] ss:$40 sps:$4 sm:$0xff]   ;;  %v4112_v39 = vld [vmem:[%s6176_s3 + $0x50] ss:$40 sps:$4 sm:$0xff]  }
  0x18   : > { %2512 = vmatprep.subr.bf16.mxu0 %v4084_v15  ;;  %2585 = vmatprep.subr.bf16.mxu1 %v4087_v17  ;;  %v4075_v37 = vld [vmem:[%s4796_s15 + $0x18] sm:$0xff]   ;;  %v4120_v41 = vld [vmem:[%s6176_s3 + $0x4] ss:$40 sps:$4 sm:$0xff]   ;;  %v4118_v43 = vld [vmem:[%s6176_s3] ss:$40 sps:$4 sm:$0xff]   ;;  %v249_v15 = vlaneseq }
  0x19   : > { %v4117_v38 = vld [vmem:[%s6176_s3 + $0x554] ss:$40 sps:$4 sm:$0xff]   ;;  %v4115_v40 = vld [vmem:[%s6176_s3 + $0x550] ss:$40 sps:$4 sm:$0xff]   ;;  %v4123_v42 = vld [vmem:[%s6176_s3 + $0x504] ss:$40 sps:$4 sm:$0xff]  }
  0x1a   : > { %v4121_v44 = vld [vmem:[%s6176_s3 + $0x500] ss:$40 sps:$4 sm:$0xff]   ;;  %v4126_v45 = vld [vmem:[%s6176_s3 + $0x4b4] ss:$40 sps:$4 sm:$0xff]   ;;  %v4124_v47 = vld [vmem:[%s6176_s3 + $0x4b0] ss:$40 sps:$4 sm:$0xff]  }
  0x1b   : > { %2513 = vmatpush1.bf16.msra.mxu0 %v4082_v14  ;;  %2586 = vmatpush1.bf16.msra.mxu1 %v4085_v16  ;;  %v4129_v46 = vld [vmem:[%s6176_s3 + $0x9b4] ss:$40 sps:$4 sm:$0xff]   ;;  %v4127_v48 = vld [vmem:[%s6176_s3 + $0x9b0] ss:$40 sps:$4 sm:$0xff]   ;;  %v4132_v49 = vld [vmem:[%s6176_s3 + $0x464] ss:$40 sps:$4 sm:$0xff]  }
  0x1c   : > { %2514 = vmatprep.subr.bf16.mxu0 %v4090_v19  ;;  %2587 = vmatprep.subr.bf16.mxu1 %v4093_v21  ;;  %v4130_v50 = vld [vmem:[%s6176_s3 + $0x460] ss:$40 sps:$4 sm:$0xff]   ;;  %v4135_v51 = vld [vmem:[%s6176_s3 + $0x964] ss:$40 sps:$4 sm:$0xff]   ;;  %v4138_v53 = vld [vmem:[%s6176_s3 + $0x414] ss:$40 sps:$4 sm:$0xff]  }
  0x1d   : > { %3721 = vmatmul.mubr.msk.bf16.gmra.mxu0 %vm329_vm0, %v4073_v18  ;;  %3725 = vmatmul.mubr.msk.bf16.gmra.mxu1 %vm329_vm0, %v4073_v18  ;;  %v4133_v52 = vld [vmem:[%s6176_s3 + $0x960] ss:$40 sps:$4 sm:$0xff]   ;;  %v4141_v54 = vld [vmem:[%s6176_s3 + $0x914] ss:$40 sps:$4 sm:$0xff]   ;;  %v4136_v55 = vld [vmem:[%s6176_s3 + $0x410] ss:$40 sps:$4 sm:$0xff]  }
  0x1e   : > { %394 = vmatprep.mubr.bf16.mxu0 %v4725_v2  ;;  %467 = vmatprep.mubr.bf16.mxu1 %v4725_v2  ;;  %v4139_v56 = vld [vmem:[%s6176_s3 + $0x910] ss:$40 sps:$4 sm:$0xff]   ;;  %v4144_v57 = vld [vmem:[%s6176_s3 + $0x3c4] ss:$40 sps:$4 sm:$0xff]   ;;  %v4142_v59 = vld [vmem:[%s6176_s3 + $0x3c0] ss:$40 sps:$4 sm:$0xff]  }
  0x1f   : > { %2515 = vmatpush1.bf16.msra.mxu0 %v4088_v20  ;;  %2588 = vmatpush1.bf16.msra.mxu1 %v4091_v22  ;;  %v4147_v58 = vld [vmem:[%s6176_s3 + $0x8c4] ss:$40 sps:$4 sm:$0xff]   ;;  %v4145_v60 = vld [vmem:[%s6176_s3 + $0x8c0] ss:$40 sps:$4 sm:$0xff]   ;;  %v4150_v61 = vld [vmem:[%s6176_s3 + $0x374] ss:$40 sps:$4 sm:$0xff]  }
  0x20   : > { %2516 = vmatprep.subr.bf16.mxu0 %v4096_v23  ;;  %2589 = vmatprep.subr.bf16.mxu1 %v4099_v24  ;;  %v4153_v62 = vld [vmem:[%s6176_s3 + $0x874] ss:$40 sps:$4 sm:$0xff]   ;;  %v4148_v63 = vld [vmem:[%s6176_s3 + $0x370] ss:$40 sps:$4 sm:$0xff]   ;;  %v4156_v1 = vld [vmem:[%s6176_s3 + $0x324] ss:$40 sps:$4 sm:$0xff]  }
  0x21   : > { %v4151_v0 = vld [vmem:[%s6176_s3 + $0x870] ss:$40 sps:$4 sm:$0xff]   ;;  %v4154_v3 = vld [vmem:[%s6176_s3 + $0x320] ss:$40 sps:$4 sm:$0xff]   ;;  %v4162_v5 = vld [vmem:[%s6176_s3 + $0x2d4] ss:$40 sps:$4 sm:$0xff]  }
  0x22   : > { %v4157_v4 = vld [vmem:[%s6176_s3 + $0x820] ss:$40 sps:$4 sm:$0xff]   ;;  %v4165_v6 = vld [vmem:[%s6176_s3 + $0x7d4] ss:$40 sps:$4 sm:$0xff]   ;;  %v4160_v7 = vld [vmem:[%s6176_s3 + $0x2d0] ss:$40 sps:$4 sm:$0xff]  }
  0x23   : > { %2517 = vmatpush1.bf16.msra.mxu0 %v4094_v25  ;;  %2590 = vmatpush1.bf16.msra.mxu1 %v4097_v26  ;;  %v4163_v8 = vld [vmem:[%s6176_s3 + $0x7d0] ss:$40 sps:$4 sm:$0xff]   ;;  %v4168_v9 = vld [vmem:[%s6176_s3 + $0x284] ss:$40 sps:$4 sm:$0xff]   ;;  %v4166_v11 = vld [vmem:[%s6176_s3 + $0x280] ss:$40 sps:$4 sm:$0xff]  }
  0x24   : > { %2518 = vmatprep.subr.bf16.mxu0 %v4102_v27  ;;  %2591 = vmatprep.subr.bf16.mxu1 %v4105_v30  ;;  %v4171_v10 = vld [vmem:[%s6176_s3 + $0x784] ss:$40 sps:$4 sm:$0xff]   ;;  %v4169_v12 = vld [vmem:[%s6176_s3 + $0x780] ss:$40 sps:$4 sm:$0xff]   ;;  %v5014_v16 = vshrl.u32 %v249_v15, 7 }
  0x25   : > { %3722 = vmatmul.mubr.msk.bf16.gmra.mxu0 %vm329_vm0, %v4074_v28  ;;  %3726 = vmatmul.mubr.msk.bf16.gmra.mxu1 %vm329_vm0, %v4074_v28  ;;  %v4174_v13 = vld [vmem:[%s6176_s3 + $0x23c] ss:$40 sps:$4 sm:$0xff]   ;;  %v247_v21 = vld [vmem:[%s6175_s2] sm:$0xf] }
  0x26   : > { %404 = vmatprep.mubr.bf16.mxu0 %v4725_v2  ;;  %477 = vmatprep.mubr.bf16.mxu1 %v4725_v2  ;;  %v4159_v2 = vld [vmem:[%s6176_s3 + $0x824] ss:$40 sps:$4 sm:$0xff]   ;;  %v5017_v17 = vsub.s32 1, %v5014_v16  ;;  %v263_v18 = vsub.s32 3, %v5014_v16  ;;  %v5021_v19 = vsub.s32 0, %v5014_v16  ;;  %v259_v20 = vsub.s32 2, %v5014_v16 }
  0x27   : > { %2519 = vmatpush1.bf16.msra.mxu0 %v4100_v29  ;;  %2592 = vmatpush1.bf16.msra.mxu1 %v4103_v31  ;;  %v4177_v14 = vld [vmem:[%s6176_s3 + $0x73c] ss:$40 sps:$4 sm:$0xff]  }
  0x28   : > { %2520 = vmatprep.subr.bf16.mxu0 %v4108_v32  ;;  %2593 = vmatprep.subr.bf16.mxu1 %v4111_v33  ;;  %v5028_v24 = vrot.slane %v247_v21, %v5017_v17  ;;  %v5032_v25 = vrot.slane %v247_v21, %v263_v18  ;;  %v5035_v26 = vrot.slane %v247_v21, %v5021_v19 }
  0x29   : > { %v5039_v27 = vrot.slane %v247_v21, %v259_v20  ;;  %v4178_v21 = vld [vmem:[%s6176_s3 + $0x1e8] ss:$40 sps:$4 sm:$0xff]  }
  0x2b   : > { %2521 = vmatpush1.bf16.msra.mxu0 %v4106_v34  ;;  %2594 = vmatpush1.bf16.msra.mxu1 %v4109_v35 }
  0x2c   : > { %2522 = vmatprep.subr.bf16.mxu0 %v4114_v36  ;;  %2595 = vmatprep.subr.bf16.mxu1 %v4117_v38 }
  0x2d   : > { %3723 = vmatmul.mubr.msk.bf16.gmra.mxu0 %vm329_vm0, %v4075_v37  ;;  %3727 = vmatmul.mubr.msk.bf16.gmra.mxu1 %vm329_vm0, %v4075_v37 }
  0x2f   : > { %2523 = vmatpush1.bf16.msra.mxu0 %v4112_v39  ;;  %2596 = vmatpush1.bf16.msra.mxu1 %v4115_v40 }
  0x30   : > { %2524 = vmatprep.subr.bf16.mxu0 %v4120_v41  ;;  %2597 = vmatprep.subr.bf16.mxu1 %v4123_v42 }
  0x33   : > { %2525 = vmatpush1.bf16.msra.mxu0 %v4118_v43  ;;  %2598 = vmatpush1.bf16.msra.mxu1 %v4121_v44 }
  0x34   : > { %2526 = vmatprep.subr.bf16.mxu0 %v4126_v45  ;;  %2599 = vmatprep.subr.bf16.mxu1 %v4129_v46 }
  0x37   : > { %2527 = vmatpush2.bf16.msra.mxu0 %v4124_v47  ;;  %2600 = vmatpush2.bf16.msra.mxu1 %v4127_v48 }
  0x38   : > { %2528 = vmatprep.subr.bf16.mxu0 %v4132_v49  ;;  %2601 = vmatprep.subr.bf16.mxu1 %v4135_v51 }
  0x3b   : > { %2529 = vmatpush2.bf16.msra.mxu0 %v4130_v50  ;;  %2602 = vmatpush2.bf16.msra.mxu1 %v4133_v52 }
  0x3c   : > { %2530 = vmatprep.subr.bf16.mxu0 %v4138_v53  ;;  %2603 = vmatprep.subr.bf16.mxu1 %v4141_v54 }
  0x3f   : > { %2531 = vmatpush2.bf16.msra.mxu0 %v4136_v55  ;;  %2604 = vmatpush2.bf16.msra.mxu1 %v4139_v56 }
  0x40   : > { %2532 = vmatprep.subr.bf16.mxu0 %v4144_v57  ;;  %2605 = vmatprep.subr.bf16.mxu1 %v4147_v58 }
  0x43   : > { %2533 = vmatpush2.bf16.msra.mxu0 %v4142_v59  ;;  %2606 = vmatpush2.bf16.msra.mxu1 %v4145_v60  ;;  %v4172_v60 = vld [vmem:[%s6176_s3 + $0x238] ss:$40 sps:$4 sm:$0xff]  }
  0x44   : > { %2534 = vmatprep.subr.bf16.mxu0 %v4150_v61  ;;  %2607 = vmatprep.subr.bf16.mxu1 %v4153_v62  ;;  %v4175_v61 = vld [vmem:[%s6176_s3 + $0x738] ss:$40 sps:$4 sm:$0xff]  }
  0x47   : > { %2535 = vmatpush2.bf16.msra.mxu0 %v4148_v63  ;;  %2608 = vmatpush2.bf16.msra.mxu1 %v4151_v0 }
  0x48   : > { %2536 = vmatprep.subr.bf16.mxu0 %v4156_v1  ;;  %2609 = vmatprep.subr.bf16.mxu1 %v4159_v2  ;;  %v4180_v2 = vld [vmem:[%s6176_s3 + $0x1ec] ss:$40 sps:$4 sm:$0xff]  }
  0x4b   : > { %2537 = vmatpush2.bf16.msra.mxu0 %v4154_v3  ;;  %2610 = vmatpush2.bf16.msra.mxu1 %v4157_v4  ;;  %v4183_v3 = vld [vmem:[%s6176_s3 + $0x6ec] ss:$40 sps:$4 sm:$0xff]  }
  0x4c   : > { %2538 = vmatprep.subr.bf16.mxu0 %v4162_v5  ;;  %2611 = vmatprep.subr.bf16.mxu1 %v4165_v6 }
  0x4f   : > { %2539 = vmatpush2.bf16.msra.mxu0 %v4160_v7  ;;  %2612 = vmatpush2.bf16.msra.mxu1 %v4163_v8 }
  0x50   : > { %2540 = vmatprep.subr.bf16.mxu0 %v4168_v9  ;;  %2613 = vmatprep.subr.bf16.mxu1 %v4171_v10 }
  0x53   : > { %2541 = vmatpush2.bf16.msra.mxu0 %v4166_v11  ;;  %2614 = vmatpush2.bf16.msra.mxu1 %v4169_v12 }
  0x54   : > { %2656 = vmatprep.subr.bf16.mxu0 %v4174_v13  ;;  %2729 = vmatprep.subr.bf16.mxu1 %v4177_v14 }
  0xd5   : > { %v376_v22 = vpop.f32.mrf.mxu0  ;;  %v449_v23 = vpop.f32.mrf.mxu1 }
  0xd6   : > { %v377_v36 = vadd.f32 %v376_v22, %v5035_v26  ;;  %v450_v37 = vadd.f32 %v449_v23, %v5039_v27 }
  0xd7   : > { %v378_v28 = vpop.f32.mrf.mxu0  ;;  %v451_v29 = vpop.f32.mrf.mxu1 }
  0xd8   : > { %v379_v32 = vadd.f32 %v378_v28, %v5028_v24  ;;  %v452_v33 = vadd.f32 %v451_v29, %v5032_v25  ;;  %v488_v50 = vmax.f32 %v377_v36, 0.0  ;;  %v490_v51 = vmax.f32 %v450_v37, 0.0  ;;  %v4181_v28 = vld [vmem:[%s6176_s3 + $0x6e8] ss:$40 sps:$4 sm:$0xff]   ;;  %v4186_v29 = vld [vmem:[%s6176_s3 + $0x19c] ss:$40 sps:$4 sm:$0xff]  }
  0xd9   : > { %v380_v30 = vpop.f32.mrf.mxu0  ;;  %v453_v31 = vpop.f32.mrf.mxu1 }
  0xda   : > { %v381_v34 = vadd.f32 %v380_v30, %v5035_v26  ;;  %v454_v35 = vadd.f32 %v453_v31, %v5039_v27  ;;  %v489_v46 = vmax.f32 %v379_v32, 0.0  ;;  %v491_v47 = vmax.f32 %v452_v33, 0.0 }
  0xdb   : > { %v382_v38 = vpop.f32.mrf.mxu0  ;;  %v455_v39 = vpop.f32.mrf.mxu1 }
  0xdc   : > { %v383_v40 = vadd.f32 %v382_v38, %v5028_v24  ;;  %v456_v41 = vadd.f32 %v455_v39, %v5032_v25  ;;  %v492_v42 = vmax.f32 %v381_v34, 0.0  ;;  %v494_v43 = vmax.f32 %v454_v35, 0.0  ;;  %v4189_v38 = vld [vmem:[%s6176_s3 + $0x69c] ss:$40 sps:$4 sm:$0xff]  }
  0xdd   : > { %v386_v44 = vpop.f32.mrf.mxu0  ;;  %v459_v45 = vpop.f32.mrf.mxu1 }
  0xde   : > { %v493_v48 = vmax.f32 %v383_v40, 0.0  ;;  %v495_v49 = vmax.f32 %v456_v41, 0.0  ;;  %v387_v52 = vadd.f32 %v386_v44, %v5035_v26  ;;  %v460_v53 = vadd.f32 %v459_v45, %v5039_v27 }
  0xdf   : > { %v388_v54 = vpop.f32.mrf.mxu0  ;;  %v461_v55 = vpop.f32.mrf.mxu1  ;;  %v5063_v62 = vpack.c.bf16 %v492_v42, %v488_v50  ;;  %v5065_v63 = vpack.c.bf16 %v494_v43, %v490_v51  ;;  %v4184_v43 = vld [vmem:[%s6176_s3 + $0x198] ss:$40 sps:$4 sm:$0xff]   ;;  %v4195_v50 = vld [vmem:[%s6176_s3 + $0x64c] ss:$40 sps:$4 sm:$0xff]  }
  0xe0   : > { %v5051_v56 = vpack.c.bf16 %v493_v48, %v489_v46  ;;  %v5053_v57 = vpack.c.bf16 %v495_v49, %v491_v47  ;;  %v389_v58 = vadd.f32 %v388_v54, %v5028_v24  ;;  %v462_v59 = vadd.f32 %v461_v55, %v5032_v25  ;;  %v4187_v46 = vld [vmem:[%s6176_s3 + $0x698] ss:$40 sps:$4 sm:$0xff]   ;;  %v4192_v47 = vld [vmem:[%s6176_s3 + $0x14c] ss:$40 sps:$4 sm:$0xff]  }
  0xe1   : > { %v390_v0 = vpop.f32.mrf.mxu0  ;;  %v463_v1 = vpop.f32.mrf.mxu1  ;;  %v496_v6 = vmax.f32 %v387_v52, 0.0  ;;  %v498_v7 = vmax.f32 %v460_v53, 0.0 }
  0xe2   : > { %v391_v4 = vadd.f32 %v390_v0, %v5035_v26  ;;  %v464_v5 = vadd.f32 %v463_v1, %v5039_v27  ;;  %2542 = vmatprep.mubr.bf16.mxu0 %v5051_v56  ;;  %2615 = vmatprep.mubr.bf16.mxu1 %v5053_v57  ;;  %v497_v8 = vmax.f32 %v389_v58, 0.0  ;;  %v499_v9 = vmax.f32 %v462_v59, 0.0  ;;  %v4190_v1 = vld [vmem:[%s6176_s3 + $0x148] ss:$40 sps:$4 sm:$0xff]  }
  0xe3   : > { %v392_v10 = vpop.f32.mrf.mxu0  ;;  %v465_v11 = vpop.f32.mrf.mxu1  ;;  %2543 = vmatmul.mubr.bf16.vlgmr.msra.gmra.mxu0 %v5063_v62  ;;  %2616 = vmatmul.mubr.bf16.vlgmr.msra.gmra.mxu1 %v5065_v63 }
  0xe4   : > { %v500_v12 = vmax.f32 %v391_v4, 0.0  ;;  %v502_v13 = vmax.f32 %v464_v5, 0.0  ;;  %v393_v14 = vadd.f32 %v392_v10, %v5028_v24  ;;  %v466_v15 = vadd.f32 %v465_v11, %v5032_v25  ;;  %2657 = vmatpush1.bf16.msra.mxu0 %v4172_v60  ;;  %2730 = vmatpush1.bf16.msra.mxu1 %v4175_v61  ;;  %v4193_v4 = vld [vmem:[%s6176_s3 + $0x648] ss:$40 sps:$4 sm:$0xff]   ;;  %v4198_v5 = vld [vmem:[%s6176_s3 + $0xfc] ss:$40 sps:$4 sm:$0xff]  }
  0xe5   : > { %v396_v22 = vpop.f32.mrf.mxu0  ;;  %v469_v23 = vpop.f32.mrf.mxu1  ;;  %2658 = vmatprep.subr.bf16.mxu0 %v4180_v2  ;;  %2731 = vmatprep.subr.bf16.mxu1 %v4183_v3 }
  0xe6   : > { %v501_v30 = vmax.f32 %v393_v14, 0.0  ;;  %v503_v31 = vmax.f32 %v466_v15, 0.0  ;;  %v5090_v32 = vpack.c.bf16 %v500_v12, %v496_v6  ;;  %v5092_v33 = vpack.c.bf16 %v502_v13, %v498_v7  ;;  %v4201_v14 = vld [vmem:[%s6176_s3 + $0x5fc] ss:$40 sps:$4 sm:$0xff]  }
  0xe7   : > { %v397_v34 = vadd.f32 %v396_v22, %v5035_v26  ;;  %v470_v35 = vadd.f32 %v469_v23, %v5039_v27  ;;  %v398_v36 = vpop.f32.mrf.mxu0  ;;  %v471_v37 = vpop.f32.mrf.mxu1 }
  0xe8   : > { %v5099_v39 = vpack.c.bf16 %v501_v30, %v497_v8  ;;  %v5101_v40 = vpack.c.bf16 %v503_v31, %v499_v9  ;;  %v399_v41 = vadd.f32 %v398_v36, %v5028_v24  ;;  %v472_v42 = vadd.f32 %v471_v37, %v5032_v25  ;;  %2659 = vmatpush1.bf16.msra.mxu0 %v4178_v21  ;;  %v4199_v31 = vld [vmem:[%s6176_s3 + $0x5f8] ss:$40 sps:$4 sm:$0xff]   ;;  %v4207_v37 = vld [vmem:[%s6176_s3 + $0x5ac] ss:$40 sps:$4 sm:$0xff]  }
  0xe9   : > { %2732 = vmatpush1.bf16.msra.mxu1 %v4181_v28  ;;  %v400_v44 = vpop.f32.mrf.mxu0  ;;  %v473_v45 = vpop.f32.mrf.mxu1  ;;  %2660 = vmatprep.subr.bf16.mxu0 %v4186_v29  ;;  %v504_v51 = vmax.f32 %v397_v34, 0.0  ;;  %v506_v52 = vmax.f32 %v470_v35, 0.0  ;;  %v4196_v28 = vld [vmem:[%s6176_s3 + $0xf8] ss:$40 sps:$4 sm:$0xff]   ;;  %v4204_v34 = vld [vmem:[%s6176_s3 + $0xac] ss:$40 sps:$4 sm:$0xff]  }
  0xea   : > { %v401_v48 = vadd.f32 %v400_v44, %v5035_v26  ;;  %v474_v49 = vadd.f32 %v473_v45, %v5039_v27  ;;  %2552 = vmatprep.mubr.bf16.mxu0 %v5099_v39  ;;  %2625 = vmatprep.mubr.bf16.mxu1 %v5101_v40  ;;  %v505_v53 = vmax.f32 %v399_v41, 0.0  ;;  %v507_v54 = vmax.f32 %v472_v42, 0.0 }
  0xeb   : > { %2733 = vmatprep.subr.bf16.mxu1 %v4189_v38  ;;  %v402_v55 = vpop.f32.mrf.mxu0  ;;  %v475_v58 = vpop.f32.mrf.mxu1  ;;  %2553 = vmatmul.mubr.bf16.gmra.mxu0 %v5090_v32 }
  0xec   : > { %v508_v59 = vmax.f32 %v401_v48, 0.0  ;;  %v510_v60 = vmax.f32 %v474_v49, 0.0  ;;  %v403_v61 = vadd.f32 %v402_v55, %v5028_v24  ;;  %v476_v0 = vadd.f32 %v475_v58, %v5032_v25  ;;  %2626 = vmatmul.mubr.bf16.gmra.mxu1 %v5092_v33  ;;  %2661 = vmatpush1.bf16.msra.mxu0 %v4184_v43  ;;  %v4202_v48 = vld [vmem:[%s6176_s3 + $0xa8] ss:$40 sps:$4 sm:$0xff]   ;;  %v4208_v58 = vld [vmem:[%s6176_s3 + $0x58] ss:$40 sps:$4 sm:$0xff]  }
  0xed   : > { %2734 = vmatpush1.bf16.msra.mxu1 %v4187_v46  ;;  %v406_v2 = vpop.f32.mrf.mxu0  ;;  %v479_v3 = vpop.f32.mrf.mxu1  ;;  %2662 = vmatprep.subr.bf16.mxu0 %v4192_v47  ;;  %v4205_v49 = vld [vmem:[%s6176_s3 + $0x5a8] ss:$40 sps:$4 sm:$0xff]  }
  0xee   : > { %v509_v6 = vmax.f32 %v403_v61, 0.0  ;;  %v511_v7 = vmax.f32 %v476_v0, 0.0  ;;  %2735 = vmatprep.subr.bf16.mxu1 %v4195_v50  ;;  %v5134_v8 = vpack.c.bf16 %v508_v59, %v504_v51  ;;  %v5136_v9 = vpack.c.bf16 %v510_v60, %v506_v52  ;;  %v4210_v50 = vld [vmem:[%s6176_s3 + $0x5c] ss:$40 sps:$4 sm:$0xff]   ;;  %v4211_v59 = vld [vmem:[%s6176_s3 + $0x558] ss:$40 sps:$4 sm:$0xff]  }
  0xef   : > { %v407_v10 = vadd.f32 %v406_v2, %v5035_v26  ;;  %v480_v11 = vadd.f32 %v479_v3, %v5039_v27  ;;  %v408_v12 = vpop.f32.mrf.mxu0  ;;  %v481_v13 = vpop.f32.mrf.mxu1  ;;  %v4213_v52 = vld [vmem:[%s6176_s3 + $0x55c] ss:$40 sps:$4 sm:$0xff]   ;;  %v4216_v60 = vld [vmem:[%s6176_s3 + $0xc] ss:$40 sps:$4 sm:$0xff]   ;;  %v4214_v0 = vld [vmem:[%s6176_s3 + $0x8] ss:$40 sps:$4 sm:$0xff]  }
  0xf0   : > { %v5143_v15 = vpack.c.bf16 %v509_v6, %v505_v53  ;;  %v5145_v21 = vpack.c.bf16 %v511_v7, %v507_v54  ;;  %v409_v22 = vadd.f32 %v408_v12, %v5028_v24  ;;  %v482_v23 = vadd.f32 %v481_v13, %v5032_v25  ;;  %2663 = vmatpush1.bf16.msra.mxu0 %v4190_v1  ;;  %v4219_v61 = vld [vmem:[%s6176_s3 + $0x50c] ss:$40 sps:$4 sm:$0xff]   ;;  %v4217_v1 = vld [vmem:[%s6176_s3 + $0x508] ss:$40 sps:$4 sm:$0xff]   ;;  %v4222_v2 = vld [vmem:[%s6176_s3 + $0x4bc] ss:$40 sps:$4 sm:$0xff]  }
  0xf1   : > { %2736 = vmatpush1.bf16.msra.mxu1 %v4193_v4  ;;  %v410_v29 = vpop.f32.mrf.mxu0  ;;  %v483_v30 = vpop.f32.mrf.mxu1  ;;  %2664 = vmatprep.subr.bf16.mxu0 %v4198_v5  ;;  %v512_v38 = vmax.f32 %v407_v10, 0.0  ;;  %v514_v41 = vmax.f32 %v480_v11, 0.0  ;;  %v4225_v3 = vld [vmem:[%s6176_s3 + $0x9bc] ss:$40 sps:$4 sm:$0xff]   ;;  %v4220_v4 = vld [vmem:[%s6176_s3 + $0x4b8] ss:$40 sps:$4 sm:$0xff]  }
  0xf2   : > { %v411_v35 = vadd.f32 %v410_v29, %v5035_v26  ;;  %v484_v36 = vadd.f32 %v483_v30, %v5039_v27  ;;  %2562 = vmatprep.mubr.bf16.mxu0 %v5143_v15  ;;  %2635 = vmatprep.mubr.bf16.mxu1 %v5145_v21  ;;  %v513_v42 = vmax.f32 %v409_v22, 0.0  ;;  %v515_v43 = vmax.f32 %v482_v23, 0.0  ;;  %v4223_v5 = vld [vmem:[%s6176_s3 + $0x9b8] ss:$40 sps:$4 sm:$0xff]   ;;  %v4228_v6 = vld [vmem:[%s6176_s3 + $0x46c] ss:$40 sps:$4 sm:$0xff]  }
  0xf3   : > { %2737 = vmatprep.subr.bf16.mxu1 %v4201_v14  ;;  %v412_v44 = vpop.f32.mrf.mxu0  ;;  %v485_v45 = vpop.f32.mrf.mxu1  ;;  %2563 = vmatmul.mubr.bf16.gmra.mxu0 %v5134_v8  ;;  %v4231_v7 = vld [vmem:[%s6176_s3 + $0x96c] ss:$40 sps:$4 sm:$0xff]   ;;  %v4226_v10 = vld [vmem:[%s6176_s3 + $0x468] ss:$40 sps:$4 sm:$0xff]   ;;  %v4234_v12 = vld [vmem:[%s6176_s3 + $0x41c] ss:$40 sps:$4 sm:$0xff]  }
  0xf4   : > { %v516_v26 = vmax.f32 %v411_v35, 0.0  ;;  %v518_v46 = vmax.f32 %v484_v36, 0.0  ;;  %v413_v27 = vadd.f32 %v412_v44, %v5028_v24  ;;  %v486_v47 = vadd.f32 %v485_v45, %v5032_v25  ;;  %2636 = vmatmul.mubr.bf16.gmra.mxu1 %v5136_v9  ;;  %2665 = vmatpush1.bf16.msra.mxu0 %v4196_v28  ;;  %v4229_v11 = vld [vmem:[%s6176_s3 + $0x968] ss:$40 sps:$4 sm:$0xff]   ;;  %v4237_v13 = vld [vmem:[%s6176_s3 + $0x91c] ss:$40 sps:$4 sm:$0xff]  }
  0xf5   : > { %2738 = vmatpush1.bf16.msra.mxu1 %v4199_v31  ;;  %2666 = vmatprep.subr.bf16.mxu0 %v4204_v34  ;;  %v4232_v14 = vld [vmem:[%s6176_s3 + $0x418] ss:$40 sps:$4 sm:$0xff]   ;;  %v4240_v23 = vld [vmem:[%s6176_s3 + $0x3cc] ss:$40 sps:$4 sm:$0xff]   ;;  %v4238_v29 = vld [vmem:[%s6176_s3 + $0x3c8] ss:$40 sps:$4 sm:$0xff]  }
  0xf6   : > { %v517_v24 = vmax.f32 %v413_v27, 0.0  ;;  %v519_v51 = vmax.f32 %v486_v47, 0.0  ;;  %2739 = vmatprep.subr.bf16.mxu1 %v4207_v37  ;;  %v5178_v25 = vpack.c.bf16 %v516_v26, %v512_v38  ;;  %v5183_v53 = vpack.c.bf16 %v518_v46, %v514_v41  ;;  %v4235_v22 = vld [vmem:[%s6176_s3 + $0x918] ss:$40 sps:$4 sm:$0xff]   ;;  %v4243_v28 = vld [vmem:[%s6176_s3 + $0x8cc] ss:$40 sps:$4 sm:$0xff]  }
  0xf7   : > { %v4241_v30 = vld [vmem:[%s6176_s3 + $0x8c8] ss:$40 sps:$4 sm:$0xff]   ;;  %v4246_v31 = vld [vmem:[%s6176_s3 + $0x37c] ss:$40 sps:$4 sm:$0xff]   ;;  %v4244_v35 = vld [vmem:[%s6176_s3 + $0x378] ss:$40 sps:$4 sm:$0xff]  }
  0xf8   : > { %v5185_v54 = vpack.c.bf16 %v517_v24, %v513_v42  ;;  %v5187_v55 = vpack.c.bf16 %v519_v51, %v515_v43  ;;  %2667 = vmatpush1.bf16.msra.mxu0 %v4202_v48  ;;  %v4249_v34 = vld [vmem:[%s6176_s3 + $0x87c] ss:$40 sps:$4 sm:$0xff]   ;;  %v4247_v36 = vld [vmem:[%s6176_s3 + $0x878] ss:$40 sps:$4 sm:$0xff]   ;;  %v4252_v37 = vld [vmem:[%s6176_s3 + $0x32c] ss:$40 sps:$4 sm:$0xff]  }
  0xf9   : > { %2740 = vmatpush1.bf16.msra.mxu1 %v4205_v49  ;;  %2668 = vmatprep.subr.bf16.mxu0 %v4210_v50  ;;  %v4255_v38 = vld [vmem:[%s6176_s3 + $0x82c] ss:$40 sps:$4 sm:$0xff]   ;;  %v4250_v41 = vld [vmem:[%s6176_s3 + $0x328] ss:$40 sps:$4 sm:$0xff]   ;;  %v4258_v43 = vld [vmem:[%s6176_s3 + $0x2dc] ss:$40 sps:$4 sm:$0xff]  }
  0xfa   : > { %2572 = vmatprep.mubr.bf16.mxu0 %v5185_v54  ;;  %2645 = vmatprep.mubr.bf16.mxu1 %v5187_v55  ;;  %v4253_v42 = vld [vmem:[%s6176_s3 + $0x828] ss:$40 sps:$4 sm:$0xff]   ;;  %v4261_v44 = vld [vmem:[%s6176_s3 + $0x7dc] ss:$40 sps:$4 sm:$0xff]   ;;  %v4256_v45 = vld [vmem:[%s6176_s3 + $0x2d8] ss:$40 sps:$4 sm:$0xff]  }
  0xfb   : > { %2741 = vmatprep.subr.bf16.mxu1 %v4213_v52  ;;  %2573 = vmatmul.mubr.bf16.gmra.mxu0 %v5178_v25  ;;  %v4259_v26 = vld [vmem:[%s6176_s3 + $0x7d8] ss:$40 sps:$4 sm:$0xff]   ;;  %v4264_v46 = vld [vmem:[%s6176_s3 + $0x28c] ss:$40 sps:$4 sm:$0xff]   ;;  %v4262_v47 = vld [vmem:[%s6176_s3 + $0x288] ss:$40 sps:$4 sm:$0xff]  }
  0xfc   : > { %2646 = vmatmul.mubr.bf16.gmra.mxu1 %v5183_v53  ;;  %2669 = vmatpush1.bf16.msra.mxu0 %v4208_v58  ;;  %v4267_v27 = vld [vmem:[%s6176_s3 + $0x78c] ss:$40 sps:$4 sm:$0xff]   ;;  %v4265_v48 = vld [vmem:[%s6176_s3 + $0x788] ss:$40 sps:$4 sm:$0xff]  }
  0xfd   : > { %2742 = vmatpush1.bf16.msra.mxu1 %v4211_v59  ;;  %2688 = vmatprep.mubr.bf16.mxu0 %v5051_v56  ;;  %v4270_v49 = vld [vmem:[%s6176_s3 + $0x244] ss:$40 sps:$4 sm:$0xff]   ;;  %v4268_v24 = vld [vmem:[%s6176_s3 + $0x240] ss:$40 sps:$4 sm:$0xff]   ;;  %v4276_v52 = vld [vmem:[%s6176_s3 + $0x1f4] ss:$40 sps:$4 sm:$0xff]  }
  0xfe   : > { %2761 = vmatprep.mubr.bf16.mxu1 %v5053_v57  ;;  %2670 = vmatprep.subr.bf16.mxu0 %v4216_v60  ;;  %v4273_v50 = vld [vmem:[%s6176_s3 + $0x744] ss:$40 sps:$4 sm:$0xff]   ;;  %v4271_v51 = vld [vmem:[%s6176_s3 + $0x740] ss:$40 sps:$4 sm:$0xff]   ;;  %v4279_v58 = vld [vmem:[%s6176_s3 + $0x6f4] ss:$40 sps:$4 sm:$0xff]  }
  0xff   : > { %2743 = vmatprep.subr.bf16.mxu1 %v4219_v61  ;;  %v4274_v59 = vld [vmem:[%s6176_s3 + $0x1f0] ss:$40 sps:$4 sm:$0xff]   ;;  %v4282_v61 = vld [vmem:[%s6176_s3 + $0x1a4] ss:$40 sps:$4 sm:$0xff]  }
 0x100   : > { %2671 = vmatpush1.bf16.msra.mxu0 %v4214_v0  ;;  %v4277_v60 = vld [vmem:[%s6176_s3 + $0x6f0] ss:$40 sps:$4 sm:$0xff]   ;;  %v4285_v0 = vld [vmem:[%s6176_s3 + $0x6a4] ss:$40 sps:$4 sm:$0xff]  }
 0x101   : > { %2744 = vmatpush1.bf16.msra.mxu1 %v4217_v1  ;;  %2672 = vmatprep.subr.bf16.mxu0 %v4222_v2  ;;  %v4280_v1 = vld [vmem:[%s6176_s3 + $0x1a0] ss:$40 sps:$4 sm:$0xff]  }
 0x102   : > { %2745 = vmatprep.subr.bf16.mxu1 %v4225_v3  ;;  %v4283_v2 = vld [vmem:[%s6176_s3 + $0x6a0] ss:$40 sps:$4 sm:$0xff]   ;;  %v4288_v3 = vld [vmem:[%s6176_s3 + $0x154] ss:$40 sps:$4 sm:$0xff]  }
 0x104   : > { %2673 = vmatpush2.bf16.msra.mxu0 %v4220_v4  ;;  %v4291_v4 = vld [vmem:[%s6176_s3 + $0x654] ss:$40 sps:$4 sm:$0xff]  }
 0x105   : > { %2746 = vmatpush2.bf16.msra.mxu1 %v4223_v5  ;;  %2674 = vmatprep.subr.bf16.mxu0 %v4228_v6  ;;  %v4286_v5 = vld [vmem:[%s6176_s3 + $0x150] ss:$40 sps:$4 sm:$0xff]  }
 0x106   : > { %2747 = vmatprep.subr.bf16.mxu1 %v4231_v7  ;;  %v4289_v6 = vld [vmem:[%s6176_s3 + $0x650] ss:$40 sps:$4 sm:$0xff]   ;;  %v4294_v7 = vld [vmem:[%s6176_s3 + $0x104] ss:$40 sps:$4 sm:$0xff]  }
 0x108   : > { %2675 = vmatpush2.bf16.msra.mxu0 %v4226_v10  ;;  %v4297_v10 = vld [vmem:[%s6176_s3 + $0x604] ss:$40 sps:$4 sm:$0xff]  }
 0x109   : > { %2748 = vmatpush2.bf16.msra.mxu1 %v4229_v11  ;;  %2676 = vmatprep.subr.bf16.mxu0 %v4234_v12  ;;  %v4292_v11 = vld [vmem:[%s6176_s3 + $0x100] ss:$40 sps:$4 sm:$0xff]  }
 0x10a   : > { %2749 = vmatprep.subr.bf16.mxu1 %v4237_v13  ;;  %v4295_v12 = vld [vmem:[%s6176_s3 + $0x600] ss:$40 sps:$4 sm:$0xff]   ;;  %v4300_v13 = vld [vmem:[%s6176_s3 + $0xb4] ss:$40 sps:$4 sm:$0xff]  }
 0x10c   : > { %2677 = vmatpush2.bf16.msra.mxu0 %v4232_v14  ;;  %v4303_v14 = vld [vmem:[%s6176_s3 + $0x5b4] ss:$40 sps:$4 sm:$0xff]  }
 0x10d   : > { %2750 = vmatpush2.bf16.msra.mxu1 %v4235_v22  ;;  %2678 = vmatprep.subr.bf16.mxu0 %v4240_v23  ;;  %v4298_v22 = vld [vmem:[%s6176_s3 + $0xb0] ss:$40 sps:$4 sm:$0xff]  }
 0x10e   : > { %2751 = vmatprep.subr.bf16.mxu1 %v4243_v28  ;;  %v4301_v23 = vld [vmem:[%s6176_s3 + $0x5b0] ss:$40 sps:$4 sm:$0xff]   ;;  %v4306_v28 = vld [vmem:[%s6176_s3 + $0x64] ss:$40 sps:$4 sm:$0xff]  }
 0x110   : > { %2679 = vmatpush2.bf16.msra.mxu0 %v4238_v29  ;;  %v4309_v29 = vld [vmem:[%s6176_s3 + $0x564] ss:$40 sps:$4 sm:$0xff]  }
 0x111   : > { %2752 = vmatpush2.bf16.msra.mxu1 %v4241_v30  ;;  %2680 = vmatprep.subr.bf16.mxu0 %v4246_v31  ;;  %v4304_v30 = vld [vmem:[%s6176_s3 + $0x60] ss:$40 sps:$4 sm:$0xff]  }
 0x112   : > { %2753 = vmatprep.subr.bf16.mxu1 %v4249_v34  ;;  %v4307_v31 = vld [vmem:[%s6176_s3 + $0x560] ss:$40 sps:$4 sm:$0xff]   ;;  %v4312_v34 = vld [vmem:[%s6176_s3 + $0x14] ss:$40 sps:$4 sm:$0xff]  }
 0x114   : > { %2681 = vmatpush2.bf16.msra.mxu0 %v4244_v35  ;;  %v4315_v35 = vld [vmem:[%s6176_s3 + $0x514] ss:$40 sps:$4 sm:$0xff]  }
 0x115   : > { %2754 = vmatpush2.bf16.msra.mxu1 %v4247_v36  ;;  %2682 = vmatprep.subr.bf16.mxu0 %v4252_v37  ;;  %v4310_v36 = vld [vmem:[%s6176_s3 + $0x10] ss:$40 sps:$4 sm:$0xff]  }
 0x116   : > { %2755 = vmatprep.subr.bf16.mxu1 %v4255_v38  ;;  %v4313_v37 = vld [vmem:[%s6176_s3 + $0x510] ss:$40 sps:$4 sm:$0xff]   ;;  %v4318_v38 = vld [vmem:[%s6176_s3 + $0x4c4] ss:$40 sps:$4 sm:$0xff]  }
 0x118   : > { %2683 = vmatpush2.bf16.msra.mxu0 %v4250_v41  ;;  %v4321_v41 = vld [vmem:[%s6176_s3 + $0x9c4] ss:$40 sps:$4 sm:$0xff]  }
 0x119   : > { %2756 = vmatpush2.bf16.msra.mxu1 %v4253_v42  ;;  %2684 = vmatprep.subr.bf16.mxu0 %v4258_v43  ;;  %v4316_v42 = vld [vmem:[%s6176_s3 + $0x4c0] ss:$40 sps:$4 sm:$0xff]  }
 0x11a   : > { %2757 = vmatprep.subr.bf16.mxu1 %v4261_v44  ;;  %v4319_v43 = vld [vmem:[%s6176_s3 + $0x9c0] ss:$40 sps:$4 sm:$0xff]   ;;  %v4324_v44 = vld [vmem:[%s6176_s3 + $0x474] ss:$40 sps:$4 sm:$0xff]  }
 0x11c   : > { %2685 = vmatpush2.bf16.msra.mxu0 %v4256_v45  ;;  %v4327_v45 = vld [vmem:[%s6176_s3 + $0x974] ss:$40 sps:$4 sm:$0xff]  }
 0x11d   : > { %2758 = vmatpush2.bf16.msra.mxu1 %v4259_v26  ;;  %2686 = vmatprep.subr.bf16.mxu0 %v4264_v46  ;;  %v4322_v26 = vld [vmem:[%s6176_s3 + $0x470] ss:$40 sps:$4 sm:$0xff]  }
 0x11e   : > { %2759 = vmatprep.subr.bf16.mxu1 %v4267_v27  ;;  %v4325_v46 = vld [vmem:[%s6176_s3 + $0x970] ss:$40 sps:$4 sm:$0xff]   ;;  %v4330_v27 = vld [vmem:[%s6176_s3 + $0x424] ss:$40 sps:$4 sm:$0xff]  }
 0x120   : > { %2687 = vmatpush2.bf16.msra.mxu0 %v4262_v47  ;;  %v4333_v47 = vld [vmem:[%s6176_s3 + $0x924] ss:$40 sps:$4 sm:$0xff]  }
 0x121   : > { %2760 = vmatpush2.bf16.msra.mxu1 %v4265_v48  ;;  %2802 = vmatprep.subr.bf16.mxu0 %v4270_v49  ;;  %v4328_v48 = vld [vmem:[%s6176_s3 + $0x420] ss:$40 sps:$4 sm:$0xff]  }
 0x122   : > { %2875 = vmatprep.subr.bf16.mxu1 %v4273_v50  ;;  %v4331_v49 = vld [vmem:[%s6176_s3 + $0x920] ss:$40 sps:$4 sm:$0xff]   ;;  %v4336_v50 = vld [vmem:[%s6176_s3 + $0x3d4] ss:$40 sps:$4 sm:$0xff]  }
 0x123   : > { %2689 = vmatmul.mubr.bf16.vlgmr.msra.gmra.mxu0 %v5063_v62 }
 0x124   : > { %2762 = vmatmul.mubr.bf16.vlgmr.msra.gmra.mxu1 %v5065_v63  ;;  %2698 = vmatprep.mubr.bf16.mxu0 %v5099_v39 }
 0x125   : > { %2771 = vmatprep.mubr.bf16.mxu1 %v5101_v40  ;;  %2803 = vmatpush1.bf16.msra.mxu0 %v4268_v24  ;;  %v4339_v24 = vld [vmem:[%s6176_s3 + $0x8d4] ss:$40 sps:$4 sm:$0xff]  }
 0x126   : > { %2876 = vmatpush1.bf16.msra.mxu1 %v4271_v51  ;;  %2804 = vmatprep.subr.bf16.mxu0 %v4276_v52  ;;  %v4334_v51 = vld [vmem:[%s6176_s3 + $0x3d0] ss:$40 sps:$4 sm:$0xff]  }
 0x127   : > { %2877 = vmatprep.subr.bf16.mxu1 %v4279_v58  ;;  %v4337_v52 = vld [vmem:[%s6176_s3 + $0x8d0] ss:$40 sps:$4 sm:$0xff]   ;;  %v4342_v58 = vld [vmem:[%s6176_s3 + $0x384] ss:$40 sps:$4 sm:$0xff]  }
 0x129   : > { %2805 = vmatpush1.bf16.msra.mxu0 %v4274_v59  ;;  %v4345_v59 = vld [vmem:[%s6176_s3 + $0x884] ss:$40 sps:$4 sm:$0xff]  }
 0x12a   : > { %2878 = vmatpush1.bf16.msra.mxu1 %v4277_v60  ;;  %2806 = vmatprep.subr.bf16.mxu0 %v4282_v61  ;;  %v4340_v60 = vld [vmem:[%s6176_s3 + $0x380] ss:$40 sps:$4 sm:$0xff]  }
 0x12b   : > { %2699 = vmatmul.mubr.bf16.gmra.mxu0 %v5090_v32  ;;  %2879 = vmatprep.subr.bf16.mxu1 %v4285_v0  ;;  %v4343_v61 = vld [vmem:[%s6176_s3 + $0x880] ss:$40 sps:$4 sm:$0xff]   ;;  %v4348_v0 = vld [vmem:[%s6176_s3 + $0x334] ss:$40 sps:$4 sm:$0xff]  }
 0x12c   : > { %2772 = vmatmul.mubr.bf16.gmra.mxu1 %v5092_v33  ;;  %2708 = vmatprep.mubr.bf16.mxu0 %v5143_v15 }
 0x12d   : > { %2781 = vmatprep.mubr.bf16.mxu1 %v5145_v21  ;;  %2807 = vmatpush1.bf16.msra.mxu0 %v4280_v1  ;;  %v4351_v1 = vld [vmem:[%s6176_s3 + $0x834] ss:$40 sps:$4 sm:$0xff]  }
 0x12e   : > { %2880 = vmatpush1.bf16.msra.mxu1 %v4283_v2  ;;  %2808 = vmatprep.subr.bf16.mxu0 %v4288_v3  ;;  %v4346_v2 = vld [vmem:[%s6176_s3 + $0x330] ss:$40 sps:$4 sm:$0xff]  }
 0x12f   : > { %2881 = vmatprep.subr.bf16.mxu1 %v4291_v4  ;;  %v4349_v3 = vld [vmem:[%s6176_s3 + $0x830] ss:$40 sps:$4 sm:$0xff]   ;;  %v4354_v4 = vld [vmem:[%s6176_s3 + $0x2e4] ss:$40 sps:$4 sm:$0xff]  }
 0x131   : > { %2809 = vmatpush1.bf16.msra.mxu0 %v4286_v5  ;;  %v4357_v5 = vld [vmem:[%s6176_s3 + $0x7e4] ss:$40 sps:$4 sm:$0xff]  }
 0x132   : > { %2882 = vmatpush1.bf16.msra.mxu1 %v4289_v6  ;;  %2810 = vmatprep.subr.bf16.mxu0 %v4294_v7  ;;  %v4352_v6 = vld [vmem:[%s6176_s3 + $0x2e0] ss:$40 sps:$4 sm:$0xff]  }
 0x133   : > { %2709 = vmatmul.mubr.bf16.gmra.mxu0 %v5134_v8  ;;  %2883 = vmatprep.subr.bf16.mxu1 %v4297_v10  ;;  %v4355_v7 = vld [vmem:[%s6176_s3 + $0x7e0] ss:$40 sps:$4 sm:$0xff]   ;;  %v4360_v10 = vld [vmem:[%s6176_s3 + $0x294] ss:$40 sps:$4 sm:$0xff]  }
 0x134   : > { %2782 = vmatmul.mubr.bf16.gmra.mxu1 %v5136_v9  ;;  %2718 = vmatprep.mubr.bf16.mxu0 %v5185_v54 }
 0x135   : > { %2791 = vmatprep.mubr.bf16.mxu1 %v5187_v55  ;;  %2811 = vmatpush1.bf16.msra.mxu0 %v4292_v11  ;;  %v4363_v11 = vld [vmem:[%s6176_s3 + $0x794] ss:$40 sps:$4 sm:$0xff]  }
 0x136   : > { %2884 = vmatpush1.bf16.msra.mxu1 %v4295_v12  ;;  %2812 = vmatprep.subr.bf16.mxu0 %v4300_v13  ;;  %v4358_v12 = vld [vmem:[%s6176_s3 + $0x290] ss:$40 sps:$4 sm:$0xff]  }
 0x137   : > { %2885 = vmatprep.subr.bf16.mxu1 %v4303_v14  ;;  %v4361_v13 = vld [vmem:[%s6176_s3 + $0x790] ss:$40 sps:$4 sm:$0xff]   ;;  %v4366_v14 = vld [vmem:[%s6176_s3 + $0x24c] ss:$40 sps:$4 sm:$0xff]  }
 0x139   : > { %2813 = vmatpush1.bf16.msra.mxu0 %v4298_v22  ;;  %v4369_v22 = vld [vmem:[%s6176_s3 + $0x74c] ss:$40 sps:$4 sm:$0xff]  }
 0x13a   : > { %2886 = vmatpush1.bf16.msra.mxu1 %v4301_v23  ;;  %2814 = vmatprep.subr.bf16.mxu0 %v4306_v28  ;;  %v4364_v23 = vld [vmem:[%s6176_s3 + $0x248] ss:$40 sps:$4 sm:$0xff]  }
 0x13b   : > { %2719 = vmatmul.mubr.bf16.gmra.mxu0 %v5178_v25  ;;  %2887 = vmatprep.subr.bf16.mxu1 %v4309_v29  ;;  %v4367_v28 = vld [vmem:[%s6176_s3 + $0x748] ss:$40 sps:$4 sm:$0xff]   ;;  %v4372_v29 = vld [vmem:[%s6176_s3 + $0x1fc] ss:$40 sps:$4 sm:$0xff]  }
 0x13c   : > { %2792 = vmatmul.mubr.bf16.gmra.mxu1 %v5183_v53  ;;  %2834 = vmatprep.mubr.bf16.mxu0 %v5051_v56 }
 0x13d   : > { %2815 = vmatpush1.bf16.msra.mxu0 %v4304_v30  ;;  %2907 = vmatprep.mubr.bf16.mxu1 %v5053_v57  ;;  %v4375_v30 = vld [vmem:[%s6176_s3 + $0x6fc] ss:$40 sps:$4 sm:$0xff]  }
 0x13e   : > { %2888 = vmatpush1.bf16.msra.mxu1 %v4307_v31  ;;  %2816 = vmatprep.subr.bf16.mxu0 %v4312_v34  ;;  %v4370_v31 = vld [vmem:[%s6176_s3 + $0x1f8] ss:$40 sps:$4 sm:$0xff]  }
 0x13f   : > { %2889 = vmatprep.subr.bf16.mxu1 %v4315_v35  ;;  %v4373_v34 = vld [vmem:[%s6176_s3 + $0x6f8] ss:$40 sps:$4 sm:$0xff]   ;;  %v4378_v35 = vld [vmem:[%s6176_s3 + $0x1ac] ss:$40 sps:$4 sm:$0xff]  }
 0x141   : > { %2817 = vmatpush1.bf16.msra.mxu0 %v4310_v36  ;;  %v4381_v36 = vld [vmem:[%s6176_s3 + $0x6ac] ss:$40 sps:$4 sm:$0xff]  }
 0x142   : > { %2890 = vmatpush1.bf16.msra.mxu1 %v4313_v37  ;;  %2818 = vmatprep.subr.bf16.mxu0 %v4318_v38  ;;  %v4376_v37 = vld [vmem:[%s6176_s3 + $0x1a8] ss:$40 sps:$4 sm:$0xff]  }
 0x143   : > { %2891 = vmatprep.subr.bf16.mxu1 %v4321_v41  ;;  %v4379_v38 = vld [vmem:[%s6176_s3 + $0x6a8] ss:$40 sps:$4 sm:$0xff]   ;;  %v4384_v41 = vld [vmem:[%s6176_s3 + $0x15c] ss:$40 sps:$4 sm:$0xff]  }
 0x145   : > { %2819 = vmatpush2.bf16.msra.mxu0 %v4316_v42  ;;  %v4387_v42 = vld [vmem:[%s6176_s3 + $0x65c] ss:$40 sps:$4 sm:$0xff]  }
 0x146   : > { %2892 = vmatpush2.bf16.msra.mxu1 %v4319_v43  ;;  %2820 = vmatprep.subr.bf16.mxu0 %v4324_v44  ;;  %v4382_v43 = vld [vmem:[%s6176_s3 + $0x158] ss:$40 sps:$4 sm:$0xff]  }
 0x147   : > { %2893 = vmatprep.subr.bf16.mxu1 %v4327_v45  ;;  %v4385_v44 = vld [vmem:[%s6176_s3 + $0x658] ss:$40 sps:$4 sm:$0xff]   ;;  %v4390_v45 = vld [vmem:[%s6176_s3 + $0x10c] ss:$40 sps:$4 sm:$0xff]  }
 0x149   : > { %2821 = vmatpush2.bf16.msra.mxu0 %v4322_v26  ;;  %v4393_v26 = vld [vmem:[%s6176_s3 + $0x60c] ss:$40 sps:$4 sm:$0xff]  }
 0x14a   : > { %2894 = vmatpush2.bf16.msra.mxu1 %v4325_v46  ;;  %2822 = vmatprep.subr.bf16.mxu0 %v4330_v27  ;;  %v4388_v46 = vld [vmem:[%s6176_s3 + $0x108] ss:$40 sps:$4 sm:$0xff]  }
 0x14b   : > { %2895 = vmatprep.subr.bf16.mxu1 %v4333_v47  ;;  %v4391_v27 = vld [vmem:[%s6176_s3 + $0x608] ss:$40 sps:$4 sm:$0xff]   ;;  %v4396_v47 = vld [vmem:[%s6176_s3 + $0xbc] ss:$40 sps:$4 sm:$0xff]  }
 0x14d   : > { %2823 = vmatpush2.bf16.msra.mxu0 %v4328_v48  ;;  %v4399_v48 = vld [vmem:[%s6176_s3 + $0x5bc] ss:$40 sps:$4 sm:$0xff]  }
 0x14e   : > { %2896 = vmatpush2.bf16.msra.mxu1 %v4331_v49  ;;  %2824 = vmatprep.subr.bf16.mxu0 %v4336_v50  ;;  %v4394_v49 = vld [vmem:[%s6176_s3 + $0xb8] ss:$40 sps:$4 sm:$0xff]  }
 0x14f   : > { %2897 = vmatprep.subr.bf16.mxu1 %v4339_v24  ;;  %v4397_v50 = vld [vmem:[%s6176_s3 + $0x5b8] ss:$40 sps:$4 sm:$0xff]   ;;  %v4402_v24 = vld [vmem:[%s6176_s3 + $0x6c] ss:$40 sps:$4 sm:$0xff]  }
 0x151   : > { %2825 = vmatpush2.bf16.msra.mxu0 %v4334_v51  ;;  %v4405_v51 = vld [vmem:[%s6176_s3 + $0x56c] ss:$40 sps:$4 sm:$0xff]  }
 0x152   : > { %2898 = vmatpush2.bf16.msra.mxu1 %v4337_v52  ;;  %2826 = vmatprep.subr.bf16.mxu0 %v4342_v58  ;;  %v4400_v52 = vld [vmem:[%s6176_s3 + $0x68] ss:$40 sps:$4 sm:$0xff]  }
 0x153   : > { %2899 = vmatprep.subr.bf16.mxu1 %v4345_v59  ;;  %v4403_v58 = vld [vmem:[%s6176_s3 + $0x568] ss:$40 sps:$4 sm:$0xff]   ;;  %v4408_v59 = vld [vmem:[%s6176_s3 + $0x1c] ss:$40 sps:$4 sm:$0xff]  }
 0x155   : > { %2827 = vmatpush2.bf16.msra.mxu0 %v4340_v60  ;;  %v4411_v60 = vld [vmem:[%s6176_s3 + $0x51c] ss:$40 sps:$4 sm:$0xff]  }
 0x156   : > { %2900 = vmatpush2.bf16.msra.mxu1 %v4343_v61  ;;  %2828 = vmatprep.subr.bf16.mxu0 %v4348_v0  ;;  %v4406_v61 = vld [vmem:[%s6176_s3 + $0x18] ss:$40 sps:$4 sm:$0xff]  }
 0x157   : > { %2901 = vmatprep.subr.bf16.mxu1 %v4351_v1  ;;  %v4409_v0 = vld [vmem:[%s6176_s3 + $0x518] ss:$40 sps:$4 sm:$0xff]   ;;  %v4414_v1 = vld [vmem:[%s6176_s3 + $0x4cc] ss:$40 sps:$4 sm:$0xff]  }
 0x159   : > { %2829 = vmatpush2.bf16.msra.mxu0 %v4346_v2  ;;  %v4417_v2 = vld [vmem:[%s6176_s3 + $0x9cc] ss:$40 sps:$4 sm:$0xff]  }
 0x15a   : > { %2902 = vmatpush2.bf16.msra.mxu1 %v4349_v3  ;;  %2830 = vmatprep.subr.bf16.mxu0 %v4354_v4  ;;  %v4412_v3 = vld [vmem:[%s6176_s3 + $0x4c8] ss:$40 sps:$4 sm:$0xff]  }
 0x15b   : > { %2903 = vmatprep.subr.bf16.mxu1 %v4357_v5  ;;  %v4415_v4 = vld [vmem:[%s6176_s3 + $0x9c8] ss:$40 sps:$4 sm:$0xff]   ;;  %v4420_v5 = vld [vmem:[%s6176_s3 + $0x47c] ss:$40 sps:$4 sm:$0xff]  }
 0x15d   : > { %2831 = vmatpush2.bf16.msra.mxu0 %v4352_v6  ;;  %v4423_v6 = vld [vmem:[%s6176_s3 + $0x97c] ss:$40 sps:$4 sm:$0xff]  }
 0x15e   : > { %2904 = vmatpush2.bf16.msra.mxu1 %v4355_v7  ;;  %2832 = vmatprep.subr.bf16.mxu0 %v4360_v10  ;;  %v4418_v7 = vld [vmem:[%s6176_s3 + $0x478] ss:$40 sps:$4 sm:$0xff]  }
 0x15f   : > { %2905 = vmatprep.subr.bf16.mxu1 %v4363_v11  ;;  %v4421_v10 = vld [vmem:[%s6176_s3 + $0x978] ss:$40 sps:$4 sm:$0xff]   ;;  %v4426_v11 = vld [vmem:[%s6176_s3 + $0x42c] ss:$40 sps:$4 sm:$0xff]  }
 0x161   : > { %2833 = vmatpush2.bf16.msra.mxu0 %v4358_v12  ;;  %v4429_v12 = vld [vmem:[%s6176_s3 + $0x92c] ss:$40 sps:$4 sm:$0xff]  }
 0x162   : > { %2906 = vmatpush2.bf16.msra.mxu1 %v4361_v13  ;;  %2948 = vmatprep.subr.bf16.mxu0 %v4366_v14  ;;  %v4424_v13 = vld [vmem:[%s6176_s3 + $0x428] ss:$40 sps:$4 sm:$0xff]  }
 0x163   : > { %3021 = vmatprep.subr.bf16.mxu1 %v4369_v22  ;;  %v4427_v14 = vld [vmem:[%s6176_s3 + $0x928] ss:$40 sps:$4 sm:$0xff]   ;;  %v4432_v22 = vld [vmem:[%s6176_s3 + $0x3dc] ss:$40 sps:$4 sm:$0xff]  }
 0x164   : > { %2835 = vmatmul.mubr.bf16.vlgmr.msra.gmra.mxu0 %v5063_v62 }
 0x165   : > { %2908 = vmatmul.mubr.bf16.vlgmr.msra.gmra.mxu1 %v5065_v63  ;;  %2844 = vmatprep.mubr.bf16.mxu0 %v5099_v39 }
 0x166   : > { %2917 = vmatprep.mubr.bf16.mxu1 %v5101_v40  ;;  %2949 = vmatpush1.bf16.msra.mxu0 %v4364_v23  ;;  %v4435_v23 = vld [vmem:[%s6176_s3 + $0x8dc] ss:$40 sps:$4 sm:$0xff]  }
 0x167   : > { %3022 = vmatpush1.bf16.msra.mxu1 %v4367_v28  ;;  %2950 = vmatprep.subr.bf16.mxu0 %v4372_v29  ;;  %v4430_v28 = vld [vmem:[%s6176_s3 + $0x3d8] ss:$40 sps:$4 sm:$0xff]  }
 0x168   : > { %3023 = vmatprep.subr.bf16.mxu1 %v4375_v30  ;;  %v4433_v29 = vld [vmem:[%s6176_s3 + $0x8d8] ss:$40 sps:$4 sm:$0xff]   ;;  %v4438_v30 = vld [vmem:[%s6176_s3 + $0x38c] ss:$40 sps:$4 sm:$0xff]  }
 0x16a   : > { %2951 = vmatpush1.bf16.msra.mxu0 %v4370_v31  ;;  %v4441_v31 = vld [vmem:[%s6176_s3 + $0x88c] ss:$40 sps:$4 sm:$0xff]  }
 0x16b   : > { %3024 = vmatpush1.bf16.msra.mxu1 %v4373_v34  ;;  %2952 = vmatprep.subr.bf16.mxu0 %v4378_v35  ;;  %v4436_v34 = vld [vmem:[%s6176_s3 + $0x388] ss:$40 sps:$4 sm:$0xff]  }
 0x16c   : > { %2845 = vmatmul.mubr.bf16.gmra.mxu0 %v5090_v32  ;;  %3025 = vmatprep.subr.bf16.mxu1 %v4381_v36  ;;  %v4439_v35 = vld [vmem:[%s6176_s3 + $0x888] ss:$40 sps:$4 sm:$0xff]   ;;  %v4444_v36 = vld [vmem:[%s6176_s3 + $0x33c] ss:$40 sps:$4 sm:$0xff]  }
 0x16d   : > { %2918 = vmatmul.mubr.bf16.gmra.mxu1 %v5092_v33  ;;  %2854 = vmatprep.mubr.bf16.mxu0 %v5143_v15 }
 0x16e   : > { %2927 = vmatprep.mubr.bf16.mxu1 %v5145_v21  ;;  %2953 = vmatpush1.bf16.msra.mxu0 %v4376_v37  ;;  %v4447_v37 = vld [vmem:[%s6176_s3 + $0x83c] ss:$40 sps:$4 sm:$0xff]  }
 0x16f   : > { %3026 = vmatpush1.bf16.msra.mxu1 %v4379_v38  ;;  %2954 = vmatprep.subr.bf16.mxu0 %v4384_v41  ;;  %v4442_v38 = vld [vmem:[%s6176_s3 + $0x338] ss:$40 sps:$4 sm:$0xff]  }
 0x170   : > { %3027 = vmatprep.subr.bf16.mxu1 %v4387_v42  ;;  %v4445_v41 = vld [vmem:[%s6176_s3 + $0x838] ss:$40 sps:$4 sm:$0xff]   ;;  %v4450_v42 = vld [vmem:[%s6176_s3 + $0x2ec] ss:$40 sps:$4 sm:$0xff]  }
 0x172   : > { %2955 = vmatpush1.bf16.msra.mxu0 %v4382_v43  ;;  %v4453_v43 = vld [vmem:[%s6176_s3 + $0x7ec] ss:$40 sps:$4 sm:$0xff]  }
 0x173   : > { %3028 = vmatpush1.bf16.msra.mxu1 %v4385_v44  ;;  %2956 = vmatprep.subr.bf16.mxu0 %v4390_v45  ;;  %v4448_v44 = vld [vmem:[%s6176_s3 + $0x2e8] ss:$40 sps:$4 sm:$0xff]  }
 0x174   : > { %2855 = vmatmul.mubr.bf16.gmra.mxu0 %v5134_v8  ;;  %3029 = vmatprep.subr.bf16.mxu1 %v4393_v26  ;;  %v4451_v45 = vld [vmem:[%s6176_s3 + $0x7e8] ss:$40 sps:$4 sm:$0xff]   ;;  %v4456_v26 = vld [vmem:[%s6176_s3 + $0x29c] ss:$40 sps:$4 sm:$0xff]  }
 0x175   : > { %2928 = vmatmul.mubr.bf16.gmra.mxu1 %v5136_v9  ;;  %2864 = vmatprep.mubr.bf16.mxu0 %v5185_v54 }
 0x176   : > { %2937 = vmatprep.mubr.bf16.mxu1 %v5187_v55  ;;  %2957 = vmatpush1.bf16.msra.mxu0 %v4388_v46  ;;  %v4459_v46 = vld [vmem:[%s6176_s3 + $0x79c] ss:$40 sps:$4 sm:$0xff]  }
 0x177   : > { %3030 = vmatpush1.bf16.msra.mxu1 %v4391_v27  ;;  %2958 = vmatprep.subr.bf16.mxu0 %v4396_v47  ;;  %v5722_v27 = vld [vmem:[%s6177_s4] sm:$0xff] }
 0x178   : > { %3031 = vmatprep.subr.bf16.mxu1 %v4399_v48  ;;  %v4454_v47 = vld [vmem:[%s6176_s3 + $0x298] ss:$40 sps:$4 sm:$0xff]  }
 0x179   : > { %v4457_v48 = vld [vmem:[%s6176_s3 + $0x798] ss:$40 sps:$4 sm:$0xff]  }
 0x17a   : > { %2959 = vmatpush1.bf16.msra.mxu0 %v4394_v49  ;;  %v4462_v49 = vld [vmem:[%s6176_s3 + $0x254] ss:$40 sps:$4 sm:$0xff]  }
 0x17b   : > { %3032 = vmatpush1.bf16.msra.mxu1 %v4397_v50  ;;  %2960 = vmatprep.subr.bf16.mxu0 %v4402_v24  ;;  %v4465_v50 = vld [vmem:[%s6176_s3 + $0x754] ss:$40 sps:$4 sm:$0xff]   ;;  %v5738_v24 = vrot.slane %v5722_v27, %v5021_v19 }
 0x17c   : > { %2865 = vmatmul.mubr.bf16.gmra.mxu0 %v5178_v25  ;;  %3033 = vmatprep.subr.bf16.mxu1 %v4405_v51  ;;  %v5742_v51 = vrot.slane %v5722_v27, %v5017_v17 }
 0x17d   : > { %2938 = vmatmul.mubr.bf16.gmra.mxu1 %v5183_v53  ;;  %2980 = vmatprep.mubr.bf16.mxu0 %v5051_v56 }
 0x17e   : > { %2961 = vmatpush1.bf16.msra.mxu0 %v4400_v52  ;;  %3053 = vmatprep.mubr.bf16.mxu1 %v5053_v57  ;;  %v4460_v52 = vld [vmem:[%s6176_s3 + $0x250] ss:$40 sps:$4 sm:$0xff]  }
 0x17f   : > { %3034 = vmatpush1.bf16.msra.mxu1 %v4403_v58  ;;  %2962 = vmatprep.subr.bf16.mxu0 %v4408_v59 }
 0x180   : > { %3035 = vmatprep.subr.bf16.mxu1 %v4411_v60  ;;  %v4463_v60 = vld [vmem:[%s6176_s3 + $0x750] ss:$40 sps:$4 sm:$0xff]  }
 0x182   : > { %2963 = vmatpush1.bf16.msra.mxu0 %v4406_v61 }
 0x183   : > { %3036 = vmatpush1.bf16.msra.mxu1 %v4409_v0  ;;  %2964 = vmatprep.subr.bf16.mxu0 %v4414_v1  ;;  %v4468_v0 = vld [vmem:[%s6176_s3 + $0x204] ss:$40 sps:$4 sm:$0xff]  }
 0x184   : > { %3037 = vmatprep.subr.bf16.mxu1 %v4417_v2 }
 0x186   : > { %2965 = vmatpush2.bf16.msra.mxu0 %v4412_v3  ;;  %v4471_v3 = vld [vmem:[%s6176_s3 + $0x704] ss:$40 sps:$4 sm:$0xff]  }
 0x187   : > { %3038 = vmatpush2.bf16.msra.mxu1 %v4415_v4  ;;  %2966 = vmatprep.subr.bf16.mxu0 %v4420_v5 }
 0x188   : > { %3039 = vmatprep.subr.bf16.mxu1 %v4423_v6  ;;  %v4466_v6 = vld [vmem:[%s6176_s3 + $0x200] ss:$40 sps:$4 sm:$0xff]  }
 0x18a   : > { %2967 = vmatpush2.bf16.msra.mxu0 %v4418_v7 }
 0x18b   : > { %3040 = vmatpush2.bf16.msra.mxu1 %v4421_v10  ;;  %2968 = vmatprep.subr.bf16.mxu0 %v4426_v11 }
 0x18c   : > { %3041 = vmatprep.subr.bf16.mxu1 %v4429_v12 }
 0x18e   : > { %2969 = vmatpush2.bf16.msra.mxu0 %v4424_v13  ;;  %v4469_v13 = vld [vmem:[%s6176_s3 + $0x700] ss:$40 sps:$4 sm:$0xff]  }
 0x18f   : > { %3042 = vmatpush2.bf16.msra.mxu1 %v4427_v14  ;;  %2970 = vmatprep.subr.bf16.mxu0 %v4432_v22  ;;  %v4474_v22 = vld [vmem:[%s6176_s3 + $0x1b4] ss:$40 sps:$4 sm:$0xff]  }
 0x190   : > { %3043 = vmatprep.subr.bf16.mxu1 %v4435_v23 }
 0x192   : > { %2971 = vmatpush2.bf16.msra.mxu0 %v4430_v28  ;;  %v4477_v28 = vld [vmem:[%s6176_s3 + $0x6b4] ss:$40 sps:$4 sm:$0xff]  }
 0x193   : > { %3044 = vmatpush2.bf16.msra.mxu1 %v4433_v29  ;;  %2972 = vmatprep.subr.bf16.mxu0 %v4438_v30 }
 0x194   : > { %3045 = vmatprep.subr.bf16.mxu1 %v4441_v31 }
 0x196   : > { %2973 = vmatpush2.bf16.msra.mxu0 %v4436_v34 }
 0x197   : > { %3046 = vmatpush2.bf16.msra.mxu1 %v4439_v35  ;;  %2974 = vmatprep.subr.bf16.mxu0 %v4444_v36  ;;  %v4472_v35 = vld [vmem:[%s6176_s3 + $0x1b0] ss:$40 sps:$4 sm:$0xff]  }
 0x198   : > { %3047 = vmatprep.subr.bf16.mxu1 %v4447_v37 }
 0x19a   : > { %2975 = vmatpush2.bf16.msra.mxu0 %v4442_v38 }
 0x19b   : > { %3048 = vmatpush2.bf16.msra.mxu1 %v4445_v41  ;;  %2976 = vmatprep.subr.bf16.mxu0 %v4450_v42  ;;  %v4475_v41 = vld [vmem:[%s6176_s3 + $0x6b0] ss:$40 sps:$4 sm:$0xff]   ;;  %v4480_v42 = vld [vmem:[%s6176_s3 + $0x164] ss:$40 sps:$4 sm:$0xff]  }
 0x19c   : > { %3049 = vmatprep.subr.bf16.mxu1 %v4453_v43 }
 0x19e   : > { %2977 = vmatpush2.bf16.msra.mxu0 %v4448_v44 }
 0x19f   : > { %3050 = vmatpush2.bf16.msra.mxu1 %v4451_v45  ;;  %2978 = vmatprep.subr.bf16.mxu0 %v4456_v26  ;;  %v4483_v45 = vld [vmem:[%s6176_s3 + $0x664] ss:$40 sps:$4 sm:$0xff]  }
 0x1a0   : > { %3051 = vmatprep.subr.bf16.mxu1 %v4459_v46 }
 0x1a2   : > { %2979 = vmatpush2.bf16.msra.mxu0 %v4454_v47 }
 0x1a3   : > { %3052 = vmatpush2.bf16.msra.mxu1 %v4457_v48  ;;  %3094 = vmatprep.subr.bf16.mxu0 %v4462_v49  ;;  %v2544_v58 = vpop.f32.mrf.mxu0  ;;  %v2617_v59 = vpop.f32.mrf.mxu1 }
 0x1a4   : > { %3167 = vmatprep.subr.bf16.mxu1 %v4465_v50  ;;  %v2545_v61 = vadd.f32 %v2544_v58, %v5738_v24  ;;  %v4478_v50 = vld [vmem:[%s6176_s3 + $0x160] ss:$40 sps:$4 sm:$0xff]  }
 0x1a5   : > { %2981 = vmatmul.mubr.bf16.vlgmr.msra.gmra.mxu0 %v5063_v62  ;;  %v2546_v1 = vpop.f32.mrf.mxu0  ;;  %v2619_v2 = vpop.f32.mrf.mxu1  ;;  %v4481_v58 = vld [vmem:[%s6176_s3 + $0x660] ss:$40 sps:$4 sm:$0xff]  }
 0x1a6   : > { %3054 = vmatmul.mubr.bf16.vlgmr.msra.gmra.mxu1 %v5065_v63  ;;  %v2618_v4 = vadd.f32 %v2617_v59, %v2545_v61  ;;  %2990 = vmatprep.mubr.bf16.mxu0 %v5099_v39  ;;  %v2547_v5 = vadd.f32 %v2546_v1, %v5742_v51  ;;  %v4486_v59 = vld [vmem:[%s6176_s3 + $0x114] ss:$40 sps:$4 sm:$0xff]  }
 0x1a7   : > { %3063 = vmatprep.mubr.bf16.mxu1 %v5101_v40  ;;  %3095 = vmatpush1.bf16.msra.mxu0 %v4460_v52  ;;  %v2548_v7 = vpop.f32.mrf.mxu0  ;;  %v2621_v10 = vpop.f32.mrf.mxu1 }
 0x1a8   : > { %v3240_v11 = vmul.f32 0.5, %v2618_v4  ;;  %3168 = vmatpush1.bf16.msra.mxu1 %v4463_v60  ;;  %v2620_v12 = vadd.f32 %v2619_v2, %v2547_v5  ;;  %3096 = vmatprep.subr.bf16.mxu0 %v4468_v0  ;;  %v2549_v14 = vadd.f32 %v2548_v7, %v5738_v24  ;;  %v4489_v2 = vld [vmem:[%s6176_s3 + $0x614] ss:$40 sps:$4 sm:$0xff]  }
 0x1a9   : > { %3169 = vmatprep.subr.bf16.mxu1 %v4471_v3  ;;  %v2550_v23 = vpop.f32.mrf.mxu0  ;;  %v2623_v34 = vpop.f32.mrf.mxu1 }
 0x1aa   : > { %4556 = vtanh.f32 %v3240_v11  ;;  %v3241_v29 = vmul.f32 0.5, %v2620_v12  ;;  %v2622_v30 = vadd.f32 %v2621_v10, %v2549_v14  ;;  %v2551_v31 = vadd.f32 %v2550_v23, %v5742_v51  ;;  %v4484_v10 = vld [vmem:[%s6176_s3 + $0x110] ss:$40 sps:$4 sm:$0xff]  }
 0x1ab   : > { %3097 = vmatpush1.bf16.msra.mxu0 %v4466_v6  ;;  %v2554_v36 = vpop.f32.mrf.mxu0  ;;  %v4487_v12 = vld [vmem:[%s6176_s3 + $0x610] ss:$40 sps:$4 sm:$0xff]  }
 0x1ac   : > { %4558 = vtanh.f32 %v3241_v29  ;;  %v3250_v37 = vmul.f32 0.5, %v2622_v30  ;;  %3170 = vmatpush1.bf16.msra.mxu1 %v4469_v13  ;;  %v2624_v38 = vadd.f32 %v2623_v34, %v2551_v31  ;;  %3098 = vmatprep.subr.bf16.mxu0 %v4474_v22  ;;  %v2555_v43 = vadd.f32 %v2554_v36, %v5738_v24  ;;  %v2627_v44 = vpop.f32.mrf.mxu1  ;;  %v4492_v13 = vld [vmem:[%s6176_s3 + $0xc4] ss:$40 sps:$4 sm:$0xff]  }
 0x1ad   : > { %2991 = vmatmul.mubr.bf16.gmra.mxu0 %v5090_v32  ;;  %3171 = vmatprep.subr.bf16.mxu1 %v4477_v28  ;;  %v2556_v26 = vpop.f32.mrf.mxu0  ;;  %v4495_v29 = vld [vmem:[%s6176_s3 + $0x5c4] ss:$40 sps:$4 sm:$0xff]  }
 0x1ae   : > { %4560 = vtanh.f32 %v3250_v37  ;;  %v3251_v46 = vmul.f32 0.5, %v2624_v38  ;;  %3064 = vmatmul.mubr.bf16.gmra.mxu1 %v5092_v33  ;;  %3000 = vmatprep.mubr.bf16.mxu0 %v5143_v15  ;;  %v2557_v47 = vadd.f32 %v2556_v26, %v5742_v51  ;;  %v2628_v48 = vadd.f32 %v2627_v44, %v2555_v43  ;;  %v2629_v49 = vpop.f32.mrf.mxu1  ;;  %v4490_v38 = vld [vmem:[%s6176_s3 + $0xc0] ss:$40 sps:$4 sm:$0xff]   ;;  %v4498_v44 = vld [vmem:[%s6176_s3 + $0x74] ss:$40 sps:$4 sm:$0xff]  }
 0x1af   : > { %3073 = vmatprep.mubr.bf16.mxu1 %v5145_v21  ;;  %3099 = vmatpush1.bf16.msra.mxu0 %v4472_v35  ;;  %v2558_v52 = vpop.f32.mrf.mxu0  ;;  %v4493_v43 = vld [vmem:[%s6176_s3 + $0x5c0] ss:$40 sps:$4 sm:$0xff]  }
 0x1b0   : > { %4562 = vtanh.f32 %v3251_v46  ;;  %3172 = vmatpush1.bf16.msra.mxu1 %v4475_v41  ;;  %3100 = vmatprep.subr.bf16.mxu0 %v4480_v42  ;;  %v3260_v60 = vmul.f32 0.5, %v2628_v48  ;;  %v2559_v61 = vadd.f32 %v2558_v52, %v5738_v24  ;;  %v2630_v0 = vadd.f32 %v2629_v49, %v2557_v47  ;;  %v2631_v1 = vpop.f32.mrf.mxu1  ;;  %v4501_v48 = vld [vmem:[%s6176_s3 + $0x574] ss:$40 sps:$4 sm:$0xff]  }
 0x1b1   : > { %3173 = vmatprep.subr.bf16.mxu1 %v4483_v45  ;;  %v2560_v3 = vpop.f32.mrf.mxu0 }
 0x1b2   : > { %4564 = vtanh.f32 %v3260_v60  ;;  %v3261_v4 = vmul.f32 0.5, %v2630_v0  ;;  %v2561_v5 = vadd.f32 %v2560_v3, %v5742_v51  ;;  %v2632_v6 = vadd.f32 %v2631_v1, %v2559_v61  ;;  %v2633_v7 = vpop.f32.mrf.mxu1  ;;  %v4496_v0 = vld [vmem:[%s6176_s3 + $0x70] ss:$40 sps:$4 sm:$0xff]  }
 0x1b3   : > { %3101 = vmatpush1.bf16.msra.mxu0 %v4478_v50  ;;  %v2564_v11 = vpop.f32.mrf.mxu0 }
 0x1b4   : > { %3174 = vmatpush1.bf16.msra.mxu1 %v4481_v58  ;;  %3102 = vmatprep.subr.bf16.mxu0 %v4486_v59  ;;  %4566 = vtanh.f32 %v3261_v4  ;;  %v3270_v14 = vmul.f32 0.5, %v2632_v6  ;;  %v2565_v22 = vadd.f32 %v2564_v11, %v5738_v24  ;;  %v2634_v23 = vadd.f32 %v2633_v7, %v2561_v5  ;;  %v2637_v28 = vpop.f32.mrf.mxu1  ;;  %v4499_v6 = vld [vmem:[%s6176_s3 + $0x570] ss:$40 sps:$4 sm:$0xff]   ;;  %v4504_v7 = vld [vmem:[%s6176_s3 + $0x24] ss:$40 sps:$4 sm:$0xff]  }
 0x1b5   : > { %3001 = vmatmul.mubr.bf16.gmra.mxu0 %v5134_v8  ;;  %3175 = vmatprep.subr.bf16.mxu1 %v4489_v2  ;;  %v2566_v30 = vpop.f32.mrf.mxu0 }
 0x1b6   : > { %3074 = vmatmul.mubr.bf16.gmra.mxu1 %v5136_v9  ;;  %3010 = vmatprep.mubr.bf16.mxu0 %v5185_v54  ;;  %4568 = vtanh.f32 %v3270_v14  ;;  %v3271_v31 = vmul.f32 0.5, %v2634_v23  ;;  %v2567_v34 = vadd.f32 %v2566_v30, %v5742_v51  ;;  %v2638_v35 = vadd.f32 %v2637_v28, %v2565_v22  ;;  %v2639_v36 = vpop.f32.mrf.mxu1  ;;  %v4507_v14 = vld [vmem:[%s6176_s3 + $0x524] ss:$40 sps:$4 sm:$0xff]  }
 0x1b7   : > { %v4557_v37 = vpop.eup %4556  ;;  %3083 = vmatprep.mubr.bf16.mxu1 %v5187_v55  ;;  %3103 = vmatpush1.bf16.msra.mxu0 %v4484_v10  ;;  %v2568_v41 = vpop.f32.mrf.mxu0 }
 0x1b8   : > { %v3400_v42 = vmul.f32 0.5, %v4557_v37  ;;  %3176 = vmatpush1.bf16.msra.mxu1 %v4487_v12  ;;  %3104 = vmatprep.subr.bf16.mxu0 %v4492_v13  ;;  %4570 = vtanh.f32 %v3271_v31  ;;  %v3280_v45 = vmul.f32 0.5, %v2638_v35  ;;  %v2569_v26 = vadd.f32 %v2568_v41, %v5738_v24  ;;  %v2641_v46 = vpop.f32.mrf.mxu1 }
 0x1b9   : > { %v4559_v47 = vpop.eup %4558  ;;  %3177 = vmatprep.subr.bf16.mxu1 %v4495_v29  ;;  %v2640_v49 = vadd.f32 %v2639_v36, %v2567_v34  ;;  %v2570_v50 = vpop.f32.mrf.mxu0  ;;  %v4502_v36 = vld [vmem:[%s6176_s3 + $0x20] ss:$40 sps:$4 sm:$0xff]  }
 0x1ba   : > { %v3480_v52 = vadd.f32 0.5, %v3400_v42  ;;  %v3401_v58 = vmul.f32 0.5, %v4559_v47  ;;  %4572 = vtanh.f32 %v3280_v45  ;;  %v2571_v59 = vadd.f32 %v2570_v50, %v5742_v51  ;;  %v2643_v60 = vpop.f32.mrf.mxu1 }
 0x1bb   : > { %v4561_v61 = vpop.eup %4560  ;;  %3105 = vmatpush1.bf16.msra.mxu0 %v4490_v38  ;;  %v3281_v1 = vmul.f32 0.5, %v2640_v49  ;;  %v2642_v2 = vadd.f32 %v2641_v46, %v2569_v26  ;;  %v2574_v3 = vpop.f32.mrf.mxu0  ;;  %v4513_v26 = vld [vmem:[%s6176_s3 + $0x9d4] ss:$40 sps:$4 sm:$0xff]  }
 0x1bc   : > { %3560 = vst [vmem:[%s5840_s10] sm:$0xff] %v3480_v52  ;;  %v3481_v4 = vadd.f32 0.5, %v3401_v58  ;;  %v3410_v5 = vmul.f32 0.5, %v4561_v61  ;;  %3178 = vmatpush1.bf16.msra.mxu1 %v4493_v43  ;;  %3106 = vmatprep.subr.bf16.mxu0 %v4498_v44  ;;  %v2575_v10 = vadd.f32 %v2574_v3, %v5738_v24  ;;  %v2644_v11 = vadd.f32 %v2643_v60, %v2571_v59  ;;  %v2647_v12 = vpop.f32.mrf.mxu1  ;;  %v4511_v61 = vld [vmem:[%s6176_s3 + $0x9d0] ss:$40 sps:$4 sm:$0xff]  }
 0x1bd   : > { %v4563_v13 = vpop.eup %4562  ;;  %3011 = vmatmul.mubr.bf16.gmra.mxu0 %v5178_v25  ;;  %3179 = vmatprep.subr.bf16.mxu1 %v4501_v48  ;;  %4574 = vtanh.f32 %v3281_v1  ;;  %v3290_v22 = vmul.f32 0.5, %v2642_v2  ;;  %v2576_v23 = vpop.f32.mrf.mxu0  ;;  %v4516_v2 = vld [vmem:[%s6176_s3 + $0x484] ss:$40 sps:$4 sm:$0xff]  }
 0x1be   : > { %3561 = vst [vmem:[%s5840_s10 + $0x8] sm:$0xff] %v3481_v4  ;;  %v3490_v28 = vadd.f32 0.5, %v3410_v5  ;;  %v3411_v29 = vmul.f32 0.5, %v4563_v13  ;;  %3084 = vmatmul.mubr.bf16.gmra.mxu1 %v5183_v53  ;;  %3126 = vmatprep.mubr.bf16.mxu0 %v5051_v56  ;;  %v3291_v30 = vmul.f32 0.5, %v2644_v11  ;;  %v2577_v31 = vadd.f32 %v2576_v23, %v5742_v51  ;;  %v2649_v34 = vpop.f32.mrf.mxu1  ;;  %v4505_v56 = vld [vmem:[%s6176_s3 + $0x520] ss:$40 sps:$4 sm:$0xff]  }
 0x1bf   : > { %v4565_v35 = vpop.eup %4564  ;;  %3107 = vmatpush1.bf16.msra.mxu0 %v4496_v0  ;;  %3199 = vmatprep.mubr.bf16.mxu1 %v5053_v57  ;;  %4576 = vtanh.f32 %v3290_v22  ;;  %v2648_v37 = vadd.f32 %v2647_v12, %v2575_v10  ;;  %v2578_v38 = vpop.f32.mrf.mxu0  ;;  %v4510_v57 = vld [vmem:[%s6176_s3 + $0x4d4] ss:$40 sps:$4 sm:$0xff]   ;;  %v4514_v13 = vld [vmem:[%s6176_s3 + $0x480] ss:$40 sps:$4 sm:$0xff]  }
 0x1c0   : > { %3571 = vst [vmem:[%s5840_s10 + $0x50] sm:$0xff] %v3490_v28  ;;  %v3491_v41 = vadd.f32 0.5, %v3411_v29  ;;  %3180 = vmatpush1.bf16.msra.mxu1 %v4499_v6  ;;  %3108 = vmatprep.subr.bf16.mxu0 %v4504_v7  ;;  %v3420_v42 = vmul.f32 0.5, %v4565_v35  ;;  %4578 = vtanh.f32 %v3291_v30  ;;  %v2579_v43 = vadd.f32 %v2578_v38, %v5738_v24  ;;  %v2651_v44 = vpop.f32.mrf.mxu1  ;;  %v4508_v24 = vld [vmem:[%s6176_s3 + $0x4d0] ss:$40 sps:$4 sm:$0xff]  }
 0x1c1   : > { %v4567_v45 = vpop.eup %4566  ;;  %3181 = vmatprep.subr.bf16.mxu1 %v4507_v14  ;;  %v3300_v46 = vmul.f32 0.5, %v2648_v37  ;;  %v2650_v47 = vadd.f32 %v2649_v34, %v2577_v31  ;;  %v2580_v48 = vpop.f32.mrf.mxu0  ;;  %v4519_v6 = vld [vmem:[%s6176_s3 + $0x984] ss:$40 sps:$4 sm:$0xff]   ;;  %v4517_v22 = vld [vmem:[%s6176_s3 + $0x980] ss:$40 sps:$4 sm:$0xff]  }
 0x1c2   : > { %3572 = vst [vmem:[%s5840_s10 + $0x58] sm:$0xff] %v3491_v41  ;;  %v3500_v49 = vadd.f32 0.5, %v3420_v42  ;;  %v3421_v50 = vmul.f32 0.5, %v4567_v45  ;;  %v2581_v52 = vadd.f32 %v2580_v48, %v5742_v51  ;;  %v2652_v58 = vadd.f32 %v2651_v44, %v2579_v43  ;;  %v2653_v59 = vpop.f32.mrf.mxu1  ;;  %v4522_v28 = vld [vmem:[%s6176_s3 + $0x434] ss:$40 sps:$4 sm:$0xff]  }
 0x1c3   : > { %v4569_v60 = vpop.eup %4568  ;;  %3109 = vmatpush1.bf16.msra.mxu0 %v4502_v36  ;;  %4580 = vtanh.f32 %v3300_v46  ;;  %v3301_v0 = vmul.f32 0.5, %v2650_v47  ;;  %v4525_v29 = vld [vmem:[%s6176_s3 + $0x934] ss:$40 sps:$4 sm:$0xff]   ;;  %v4520_v35 = vld [vmem:[%s6176_s3 + $0x430] ss:$40 sps:$4 sm:$0xff]  }
 0x1c4   : > { %3182 = vmatpush1.bf16.msra.mxu1 %v4505_v56  ;;  %3581 = vst [vmem:[%s5840_s10 + $0xa0] sm:$0xff] %v3500_v49  ;;  %v3501_v1 = vadd.f32 0.5, %v3421_v50  ;;  %3110 = vmatprep.subr.bf16.mxu0 %v4510_v57  ;;  %v3430_v51 = vmul.f32 0.5, %v4569_v60  ;;  %v3310_v3 = vmul.f32 0.5, %v2652_v58  ;;  %v2654_v4 = vadd.f32 %v2653_v59, %v2581_v52  ;;  %v4523_v37 = vld [vmem:[%s6176_s3 + $0x930] ss:$40 sps:$4 sm:$0xff]  }
 0x1c5   : > { %v4571_v5 = vpop.eup %4570  ;;  %3183 = vmatprep.subr.bf16.mxu1 %v4513_v26  ;;  %4582 = vtanh.f32 %v3301_v0  ;;  %v4528_v38 = vld [vmem:[%s6176_s3 + $0x3e4] ss:$40 sps:$4 sm:$0xff]   ;;  %v4526_v45 = vld [vmem:[%s6176_s3 + $0x3e0] ss:$40 sps:$4 sm:$0xff]   ;;  %v4534_v48 = vld [vmem:[%s6176_s3 + $0x394] ss:$40 sps:$4 sm:$0xff]  }
 0x1c6   : > { %3582 = vst [vmem:[%s5840_s10 + $0xa8] sm:$0xff] %v3501_v1  ;;  %v3510_v7 = vadd.f32 0.5, %v3430_v51  ;;  %v3431_v10 = vmul.f32 0.5, %v4571_v5  ;;  %4584 = vtanh.f32 %v3310_v3  ;;  %v3311_v11 = vmul.f32 0.5, %v2654_v4  ;;  %v4531_v57 = vld [vmem:[%s6176_s3 + $0x8e4] ss:$40 sps:$4 sm:$0xff]  }
 0x1c7   : > { %v4573_v12 = vpop.eup %4572  ;;  %3111 = vmatpush2.bf16.msra.mxu0 %v4508_v24  ;;  %v4529_v47 = vld [vmem:[%s6176_s3 + $0x8e0] ss:$40 sps:$4 sm:$0xff]   ;;  %v4537_v50 = vld [vmem:[%s6176_s3 + $0x894] ss:$40 sps:$4 sm:$0xff]   ;;  %v4532_v24 = vld [vmem:[%s6176_s3 + $0x390] ss:$40 sps:$4 sm:$0xff]  }
 0x1c8   : > { %3184 = vmatpush2.bf16.msra.mxu1 %v4511_v61  ;;  %3591 = vst [vmem:[%s5840_s10 + $0xf0] sm:$0xff] %v3510_v7  ;;  %v3511_v14 = vadd.f32 0.5, %v3431_v10  ;;  %3112 = vmatprep.subr.bf16.mxu0 %v4516_v2  ;;  %v3440_v23 = vmul.f32 0.5, %v4573_v12  ;;  %4586 = vtanh.f32 %v3311_v11  ;;  %v4535_v61 = vld [vmem:[%s6176_s3 + $0x890] ss:$40 sps:$4 sm:$0xff]  }
 0x1c9   : > { %3185 = vmatprep.subr.bf16.mxu1 %v4519_v6  ;;  %v4540_v1 = vld [vmem:[%s6176_s3 + $0x344] ss:$40 sps:$4 sm:$0xff]   ;;  %v4538_v6 = vld [vmem:[%s6176_s3 + $0x340] ss:$40 sps:$4 sm:$0xff]   ;;  %v4546_v11 = vld [vmem:[%s6176_s3 + $0x2f4] ss:$40 sps:$4 sm:$0xff]  }
 0x1ca   : > { %v4575_v30 = vpop.eup %4574  ;;  %3592 = vst [vmem:[%s5840_s10 + $0xf8] sm:$0xff] %v3511_v14  ;;  %v3520_v31 = vadd.f32 0.5, %v3440_v23  ;;  %v4543_v3 = vld [vmem:[%s6176_s3 + $0x844] ss:$40 sps:$4 sm:$0xff]   ;;  %v4541_v10 = vld [vmem:[%s6176_s3 + $0x840] ss:$40 sps:$4 sm:$0xff]  }
 0x1cb   : > { %3113 = vmatpush2.bf16.msra.mxu0 %v4514_v13  ;;  %v3441_v34 = vmul.f32 0.5, %v4575_v30  ;;  %v4549_v12 = vld [vmem:[%s6176_s3 + $0x7f4] ss:$40 sps:$4 sm:$0xff]   ;;  %v4544_v13 = vld [vmem:[%s6176_s3 + $0x2f0] ss:$40 sps:$4 sm:$0xff]   ;;  %v5987_v30 = vrot.slane %v5722_v27, %v259_v20 }
 0x1cc   : > { %v4577_v36 = vpop.eup %4576  ;;  %3186 = vmatpush2.bf16.msra.mxu1 %v4517_v22  ;;  %3601 = vst [vmem:[%s5840_s10 + $0x140] sm:$0xff] %v3520_v31  ;;  %3114 = vmatprep.subr.bf16.mxu0 %v4522_v28  ;;  %v4547_v14 = vld [vmem:[%s6176_s3 + $0x7f0] ss:$40 sps:$4 sm:$0xff]   ;;  %v4552_v22 = vld [vmem:[%s6176_s3 + $0x2a4] ss:$40 sps:$4 sm:$0xff]   ;;  %v5992_v31 = vrot.slane %v5722_v27, %v263_v18 }
 0x1cd   : > { %v4579_v41 = vpop.eup %4578  ;;  %v3521_v56 = vadd.f32 0.5, %v3441_v34  ;;  %3187 = vmatprep.subr.bf16.mxu1 %v4525_v29  ;;  %v3450_v42 = vmul.f32 0.5, %v4577_v36  ;;  %v4555_v23 = vld [vmem:[%s6176_s3 + $0x7a4] ss:$40 sps:$4 sm:$0xff]   ;;  %v4550_v28 = vld [vmem:[%s6176_s3 + $0x2a0] ss:$40 sps:$4 sm:$0xff]  }
 0x1ce   : > { %v3451_v43 = vmul.f32 0.5, %v4579_v41  ;;  %v4553_v29 = vld [vmem:[%s6176_s3 + $0x7a0] ss:$40 sps:$4 sm:$0xff]  }
 0x1cf   : > { %3602 = vst [vmem:[%s5840_s10 + $0x148] sm:$0xff] %v3521_v56  ;;  %3115 = vmatpush2.bf16.msra.mxu0 %v4520_v35  ;;  %v3530_v44 = vadd.f32 0.5, %v3450_v42 }
 0x1d0   : > { %v4581_v26 = vpop.eup %4580  ;;  %3188 = vmatpush2.bf16.msra.mxu1 %v4523_v37  ;;  %v3531_v46 = vadd.f32 0.5, %v3451_v43  ;;  %3116 = vmatprep.subr.bf16.mxu0 %v4528_v38 }
 0x1d1   : > { %3611 = vst [vmem:[%s5840_s10 + $0x190] sm:$0xff] %v3530_v44  ;;  %3189 = vmatprep.subr.bf16.mxu1 %v4531_v57  ;;  %v3460_v49 = vmul.f32 0.5, %v4581_v26 }
 0x1d2   : > { %v4583_v52 = vpop.eup %4582  ;;  %3612 = vst [vmem:[%s5840_s10 + $0x198] sm:$0xff] %v3531_v46 }
 0x1d3   : > { %v4585_v58 = vpop.eup %4584  ;;  %3117 = vmatpush2.bf16.msra.mxu0 %v4526_v45  ;;  %v3540_v59 = vadd.f32 0.5, %v3460_v49  ;;  %v3461_v60 = vmul.f32 0.5, %v4583_v52 }
 0x1d4   : > { %3190 = vmatpush2.bf16.msra.mxu1 %v4529_v47  ;;  %3118 = vmatprep.subr.bf16.mxu0 %v4534_v48  ;;  %v3470_v0 = vmul.f32 0.5, %v4585_v58 }
 0x1d5   : > { %v4587_v51 = vpop.eup %4586  ;;  %3621 = vst [vmem:[%s5840_s10 + $0x1e0] sm:$0xff] %v3540_v59  ;;  %v3541_v2 = vadd.f32 0.5, %v3461_v60  ;;  %3191 = vmatprep.subr.bf16.mxu1 %v4537_v50 }
 0x1d6   : > { %v3550_v4 = vadd.f32 0.5, %v3470_v0  ;;  %v3471_v5 = vmul.f32 0.5, %v4587_v51 }
 0x1d7   : > { %3622 = vst [vmem:[%s5840_s10 + $0x1e8] sm:$0xff] %v3541_v2  ;;  %3119 = vmatpush2.bf16.msra.mxu0 %v4532_v24 }
 0x1d8   : > { %3192 = vmatpush2.bf16.msra.mxu1 %v4535_v61  ;;  %3631 = vst [vmem:[%s5840_s10 + $0x230] sm:$0xff] %v3550_v4  ;;  %v3551_v7 = vadd.f32 0.5, %v3471_v5  ;;  %3120 = vmatprep.subr.bf16.mxu0 %v4540_v1 }
 0x1d9   : > { %3193 = vmatprep.subr.bf16.mxu1 %v4543_v3 }
 0x1da   : > { %3632 = vst [vmem:[%s5840_s10 + $0x238] sm:$0xff] %v3551_v7 }
 0x1db   : > { %3121 = vmatpush2.bf16.msra.mxu0 %v4538_v6 }
 0x1dc   : > { %3194 = vmatpush2.bf16.msra.mxu1 %v4541_v10  ;;  %3122 = vmatprep.subr.bf16.mxu0 %v4546_v11 }
 0x1dd   : > { %3195 = vmatprep.subr.bf16.mxu1 %v4549_v12 }
 0x1df   : > { %3123 = vmatpush2.bf16.msra.mxu0 %v4544_v13 }
 0x1e0   : > { %3196 = vmatpush2.bf16.msra.mxu1 %v4547_v14  ;;  %3124 = vmatprep.subr.bf16.mxu0 %v4552_v22 }
 0x1e1   : > { %3197 = vmatprep.subr.bf16.mxu1 %v4555_v23 }
 0x1e3   : > { %3125 = vmatpush2.bf16.msra.mxu0 %v4550_v28  ;;  %v2690_v34 = vpop.f32.mrf.mxu0 }
 0x1e4   : > { %3198 = vmatpush2.bf16.msra.mxu1 %v4553_v29  ;;  %v2691_v35 = vadd.f32 %v2690_v34, %v5987_v30  ;;  %v2763_v36 = vpop.f32.mrf.mxu1 }
 0x1e5   : > { %v2692_v37 = vpop.f32.mrf.mxu0 }
 0x1e6   : > { %v2764_v38 = vadd.f32 %v2763_v36, %v2691_v35  ;;  %3127 = vmatmul.mubr.bf16.vlgmr.msra.gmra.mxu0 %v5063_v62  ;;  %v2693_v41 = vadd.f32 %v2692_v37, %v5992_v31  ;;  %v2765_v20 = vpop.f32.mrf.mxu1 }
 0x1e7   : > { %3200 = vmatmul.mubr.bf16.vlgmr.msra.gmra.mxu1 %v5065_v63  ;;  %3136 = vmatprep.mubr.bf16.mxu0 %v5099_v39  ;;  %v2694_v56 = vpop.f32.mrf.mxu0 }
 0x1e8   : > { %v3242_v18 = vmul.f32 0.5, %v2764_v38  ;;  %3209 = vmatprep.mubr.bf16.mxu1 %v5101_v40  ;;  %v2766_v42 = vadd.f32 %v2765_v20, %v2693_v41  ;;  %v2695_v57 = vadd.f32 %v2694_v56, %v5987_v30  ;;  %v2767_v43 = vpop.f32.mrf.mxu1 }
 0x1e9   : > { %v2696_v44 = vpop.f32.mrf.mxu0 }
 0x1ea   : > { %4588 = vtanh.f32 %v3242_v18  ;;  %v3243_v45 = vmul.f32 0.5, %v2766_v42  ;;  %v2768_v26 = vadd.f32 %v2767_v43, %v2695_v57  ;;  %v2697_v62 = vadd.f32 %v2696_v44, %v5992_v31  ;;  %v2769_v46 = vpop.f32.mrf.mxu1 }
 0x1eb   : > { %v2700_v47 = vpop.f32.mrf.mxu0 }
 0x1ec   : > { %4590 = vtanh.f32 %v3243_v45  ;;  %v3252_v63 = vmul.f32 0.5, %v2768_v26  ;;  %v2770_v48 = vadd.f32 %v2769_v46, %v2697_v62  ;;  %v2701_v39 = vadd.f32 %v2700_v47, %v5987_v30  ;;  %v2773_v49 = vpop.f32.mrf.mxu1 }
 0x1ed   : > { %v2702_v50 = vpop.f32.mrf.mxu0 }
 0x1ee   : > { %4592 = vtanh.f32 %v3252_v63  ;;  %v3253_v40 = vmul.f32 0.5, %v2770_v48  ;;  %v2774_v52 = vadd.f32 %v2773_v49, %v2701_v39  ;;  %3137 = vmatmul.mubr.bf16.gmra.mxu0 %v5090_v32  ;;  %v2703_v58 = vadd.f32 %v2702_v50, %v5992_v31  ;;  %v2775_v59 = vpop.f32.mrf.mxu1 }
 0x1ef   : > { %3210 = vmatmul.mubr.bf16.gmra.mxu1 %v5092_v33  ;;  %3146 = vmatprep.mubr.bf16.mxu0 %v5143_v15  ;;  %v2704_v60 = vpop.f32.mrf.mxu0 }
 0x1f0   : > { %4594 = vtanh.f32 %v3253_v40  ;;  %v3262_v24 = vmul.f32 0.5, %v2774_v52  ;;  %3219 = vmatprep.mubr.bf16.mxu1 %v5145_v21  ;;  %v2776_v61 = vadd.f32 %v2775_v59, %v2703_v58  ;;  %v2705_v0 = vadd.f32 %v2704_v60, %v5987_v30  ;;  %v2777_v1 = vpop.f32.mrf.mxu1 }
 0x1f1   : > { %v2706_v51 = vpop.f32.mrf.mxu0 }
 0x1f2   : > { %4596 = vtanh.f32 %v3262_v24  ;;  %v3263_v2 = vmul.f32 0.5, %v2776_v61  ;;  %v2778_v32 = vadd.f32 %v2777_v1, %v2705_v0  ;;  %v2707_v3 = vadd.f32 %v2706_v51, %v5992_v31  ;;  %v2779_v4 = vpop.f32.mrf.mxu1 }
 0x1f3   : > { %v2710_v5 = vpop.f32.mrf.mxu0 }
 0x1f4   : > { %4598 = vtanh.f32 %v3263_v2  ;;  %v3272_v33 = vmul.f32 0.5, %v2778_v32  ;;  %v2780_v15 = vadd.f32 %v2779_v4, %v2707_v3  ;;  %v2711_v6 = vadd.f32 %v2710_v5, %v5987_v30  ;;  %v2783_v7 = vpop.f32.mrf.mxu1 }
 0x1f5   : > { %v2712_v10 = vpop.f32.mrf.mxu0 }
 0x1f6   : > { %4600 = vtanh.f32 %v3272_v33  ;;  %v3273_v21 = vmul.f32 0.5, %v2780_v15  ;;  %v2784_v11 = vadd.f32 %v2783_v7, %v2711_v6  ;;  %3147 = vmatmul.mubr.bf16.gmra.mxu0 %v5134_v8  ;;  %v2713_v12 = vadd.f32 %v2712_v10, %v5992_v31  ;;  %v2785_v13 = vpop.f32.mrf.mxu1 }
 0x1f7   : > { %v4589_v14 = vpop.eup %4588  ;;  %3220 = vmatmul.mubr.bf16.gmra.mxu1 %v5136_v9  ;;  %3156 = vmatprep.mubr.bf16.mxu0 %v5185_v54  ;;  %v2714_v22 = vpop.f32.mrf.mxu0 }
 0x1f8   : > { %v3402_v23 = vmul.f32 0.5, %v4589_v14  ;;  %4602 = vtanh.f32 %v3273_v21  ;;  %v3282_v28 = vmul.f32 0.5, %v2784_v11  ;;  %3229 = vmatprep.mubr.bf16.mxu1 %v5187_v55  ;;  %v2786_v29 = vadd.f32 %v2785_v13, %v2713_v12  ;;  %v2787_v34 = vpop.f32.mrf.mxu1 }
 0x1f9   : > { %v4591_v35 = vpop.eup %4590  ;;  %v2715_v8 = vadd.f32 %v2714_v22, %v5987_v30  ;;  %v2716_v36 = vpop.f32.mrf.mxu0 }
 0x1fa   : > { %v3482_v37 = vadd.f32 0.5, %v3402_v23  ;;  %v3403_v38 = vmul.f32 0.5, %v4591_v35  ;;  %4604 = vtanh.f32 %v3282_v28  ;;  %v3283_v41 = vmul.f32 0.5, %v2786_v29  ;;  %v2789_v9 = vpop.f32.mrf.mxu1 }
 0x1fb   : > { %v4593_v54 = vpop.eup %4592  ;;  %v2788_v20 = vadd.f32 %v2787_v34, %v2715_v8  ;;  %v2717_v56 = vadd.f32 %v2716_v36, %v5992_v31  ;;  %v2720_v18 = vpop.f32.mrf.mxu0 }
 0x1fc   : > { %3562 = vst [vmem:[%s5840_s10 + $0x10] sm:$0xff] %v3482_v37  ;;  %v3483_v42 = vadd.f32 0.5, %v3403_v38  ;;  %v3412_v55 = vmul.f32 0.5, %v4593_v54  ;;  %4606 = vtanh.f32 %v3283_v41  ;;  %v2721_v57 = vadd.f32 %v2720_v18, %v5987_v30  ;;  %v2793_v43 = vpop.f32.mrf.mxu1 }
 0x1fd   : > { %v4595_v44 = vpop.eup %4594  ;;  %v3292_v45 = vmul.f32 0.5, %v2788_v20  ;;  %v2790_v26 = vadd.f32 %v2789_v9, %v2717_v56  ;;  %v2722_v62 = vpop.f32.mrf.mxu0 }
 0x1fe   : > { %3563 = vst [vmem:[%s5840_s10 + $0x18] sm:$0xff] %v3483_v42  ;;  %v3492_v46 = vadd.f32 0.5, %v3412_v55  ;;  %v3413_v47 = vmul.f32 0.5, %v4595_v44  ;;  %v2794_v63 = vadd.f32 %v2793_v43, %v2721_v57  ;;  %3157 = vmatmul.mubr.bf16.gmra.mxu0 %v5178_v25  ;;  %v2723_v48 = vadd.f32 %v2722_v62, %v5992_v31  ;;  %v2795_v39 = vpop.f32.mrf.mxu1 }
 0x1ff   : > { %v4597_v49 = vpop.eup %4596  ;;  %4608 = vtanh.f32 %v3292_v45  ;;  %v3293_v50 = vmul.f32 0.5, %v2790_v26  ;;  %3230 = vmatmul.mubr.bf16.gmra.mxu1 %v5183_v53  ;;  %v2724_v40 = vpop.f32.mrf.mxu0  ;;  %v878_v44 = vsub.s32 4, %v5014_v16  ;;  %v882_v45 = vsub.s32 5, %v5014_v16 }
 0x200   : > { %3573 = vst [vmem:[%s5840_s10 + $0x60] sm:$0xff] %v3492_v46  ;;  %v3493_v52 = vadd.f32 0.5, %v3413_v47  ;;  %v3422_v58 = vmul.f32 0.5, %v4597_v49  ;;  %v3302_v59 = vmul.f32 0.5, %v2794_v63  ;;  %v2796_v60 = vadd.f32 %v2795_v39, %v2723_v48  ;;  %v2797_v24 = vpop.f32.mrf.mxu1 }
 0x201   : > { %v4599_v61 = vpop.eup %4598  ;;  %4610 = vtanh.f32 %v3293_v50  ;;  %v2725_v25 = vadd.f32 %v2724_v40, %v5987_v30  ;;  %v2726_v0 = vpop.f32.mrf.mxu0  ;;  %v6043_v26 = vrot.slane %v5722_v27, %v878_v44  ;;  %v6046_v62 = vrot.slane %v5722_v27, %v882_v45 }
 0x202   : > { %3574 = vst [vmem:[%s5840_s10 + $0x68] sm:$0xff] %v3493_v52  ;;  %v3502_v1 = vadd.f32 0.5, %v3422_v58  ;;  %v3423_v51 = vmul.f32 0.5, %v4599_v61  ;;  %4612 = vtanh.f32 %v3302_v59  ;;  %v3303_v2 = vmul.f32 0.5, %v2796_v60  ;;  %v2799_v33 = vpop.f32.mrf.mxu1 }
 0x203   : > { %v4601_v53 = vpop.eup %4600  ;;  %v2798_v32 = vadd.f32 %v2797_v24, %v2725_v25  ;;  %v2727_v3 = vadd.f32 %v2726_v0, %v5992_v31 }
 0x204   : > { %3583 = vst [vmem:[%s5840_s10 + $0xb0] sm:$0xff] %v3502_v1  ;;  %v3503_v4 = vadd.f32 0.5, %v3423_v51  ;;  %v3432_v5 = vmul.f32 0.5, %v4601_v53  ;;  %4614 = vtanh.f32 %v3303_v2 }
 0x205   : > { %v4603_v15 = vpop.eup %4602  ;;  %v3312_v30 = vmul.f32 0.5, %v2798_v32  ;;  %v2800_v6 = vadd.f32 %v2799_v33, %v2727_v3 }
 0x206   : > { %3584 = vst [vmem:[%s5840_s10 + $0xb8] sm:$0xff] %v3503_v4  ;;  %v3512_v7 = vadd.f32 0.5, %v3432_v5  ;;  %v3433_v10 = vmul.f32 0.5, %v4603_v15 }
 0x207   : > { %v4605_v21 = vpop.eup %4604  ;;  %4616 = vtanh.f32 %v3312_v30  ;;  %v3313_v11 = vmul.f32 0.5, %v2800_v6 }
 0x208   : > { %3593 = vst [vmem:[%s5840_s10 + $0x100] sm:$0xff] %v3512_v7  ;;  %v3513_v12 = vadd.f32 0.5, %v3433_v10  ;;  %v3442_v31 = vmul.f32 0.5, %v4605_v21 }
 0x209   : > { %v4607_v13 = vpop.eup %4606  ;;  %4618 = vtanh.f32 %v3313_v11 }
 0x20a   : > { %3594 = vst [vmem:[%s5840_s10 + $0x108] sm:$0xff] %v3513_v12  ;;  %v3522_v14 = vadd.f32 0.5, %v3442_v31  ;;  %v3443_v22 = vmul.f32 0.5, %v4607_v13 }
 0x20c   : > { %v4609_v23 = vpop.eup %4608  ;;  %3603 = vst [vmem:[%s5840_s10 + $0x150] sm:$0xff] %v3522_v14  ;;  %v3523_v28 = vadd.f32 0.5, %v3443_v22 }
 0x20d   : > { %v3452_v29 = vmul.f32 0.5, %v4609_v23 }
 0x20e   : > { %v4611_v34 = vpop.eup %4610  ;;  %3604 = vst [vmem:[%s5840_s10 + $0x158] sm:$0xff] %v3523_v28 }
 0x20f   : > { %v4613_v35 = vpop.eup %4612  ;;  %v3532_v8 = vadd.f32 0.5, %v3452_v29  ;;  %v3453_v36 = vmul.f32 0.5, %v4611_v34 }
 0x210   : > { %v3462_v37 = vmul.f32 0.5, %v4613_v35 }
 0x211   : > { %v4615_v38 = vpop.eup %4614  ;;  %3613 = vst [vmem:[%s5840_s10 + $0x1a0] sm:$0xff] %v3532_v8  ;;  %v3533_v41 = vadd.f32 0.5, %v3453_v36 }
 0x212   : > { %v3542_v9 = vadd.f32 0.5, %v3462_v37  ;;  %v3463_v54 = vmul.f32 0.5, %v4615_v38 }
 0x213   : > { %3614 = vst [vmem:[%s5840_s10 + $0x1a8] sm:$0xff] %v3533_v41 }
 0x214   : > { %v4617_v20 = vpop.eup %4616  ;;  %3623 = vst [vmem:[%s5840_s10 + $0x1f0] sm:$0xff] %v3542_v9  ;;  %v3543_v56 = vadd.f32 0.5, %v3463_v54 }
 0x215   : > { %v3472_v18 = vmul.f32 0.5, %v4617_v20 }
 0x216   : > { %v4619_v42 = vpop.eup %4618  ;;  %3624 = vst [vmem:[%s5840_s10 + $0x1f8] sm:$0xff] %v3543_v56 }
 0x217   : > { %v3552_v55 = vadd.f32 0.5, %v3472_v18  ;;  %v3473_v57 = vmul.f32 0.5, %v4619_v42 }
 0x219   : > { %3633 = vst [vmem:[%s5840_s10 + $0x240] sm:$0xff] %v3552_v55  ;;  %v3553_v43 = vadd.f32 0.5, %v3473_v57 }
 0x21b   : > { %3634 = vst [vmem:[%s5840_s10 + $0x248] sm:$0xff] %v3553_v43 }
 0x224   : > { %v2836_v46 = vpop.f32.mrf.mxu0 }
 0x225   : > { %v2837_v47 = vadd.f32 %v2836_v46, %v6043_v26  ;;  %v2909_v63 = vpop.f32.mrf.mxu1 }
 0x226   : > { %v2838_v48 = vpop.f32.mrf.mxu0 }
 0x227   : > { %v2910_v39 = vadd.f32 %v2909_v63, %v2837_v47  ;;  %v2839_v49 = vadd.f32 %v2838_v48, %v6046_v62  ;;  %v2911_v50 = vpop.f32.mrf.mxu1 }
 0x228   : > { %v2840_v40 = vpop.f32.mrf.mxu0 }
 0x229   : > { %v3244_v52 = vmul.f32 0.5, %v2910_v39  ;;  %v2912_v58 = vadd.f32 %v2911_v50, %v2839_v49  ;;  %v2841_v59 = vadd.f32 %v2840_v40, %v6043_v26  ;;  %v2913_v60 = vpop.f32.mrf.mxu1 }
 0x22a   : > { %v2842_v24 = vpop.f32.mrf.mxu0 }
 0x22b   : > { %4620 = vtanh.f32 %v3244_v52  ;;  %v3245_v61 = vmul.f32 0.5, %v2912_v58  ;;  %v2914_v27 = vadd.f32 %v2913_v60, %v2841_v59  ;;  %v2843_v25 = vadd.f32 %v2842_v24, %v6046_v62  ;;  %v2915_v0 = vpop.f32.mrf.mxu1 }
 0x22c   : > { %v2846_v1 = vpop.f32.mrf.mxu0 }
 0x22d   : > { %4622 = vtanh.f32 %v3245_v61  ;;  %v3254_v51 = vmul.f32 0.5, %v2914_v27  ;;  %v2916_v2 = vadd.f32 %v2915_v0, %v2843_v25  ;;  %v2847_v53 = vadd.f32 %v2846_v1, %v6043_v26  ;;  %v2919_v32 = vpop.f32.mrf.mxu1 }
 0x22e   : > { %v2848_v3 = vpop.f32.mrf.mxu0 }
 0x22f   : > { %4624 = vtanh.f32 %v3254_v51  ;;  %v3255_v4 = vmul.f32 0.5, %v2916_v2  ;;  %v2920_v5 = vadd.f32 %v2919_v32, %v2847_v53  ;;  %v2849_v33 = vadd.f32 %v2848_v3, %v6046_v62  ;;  %v2921_v15 = vpop.f32.mrf.mxu1 }
 0x230   : > { %v2850_v30 = vpop.f32.mrf.mxu0 }
 0x231   : > { %4626 = vtanh.f32 %v3255_v4  ;;  %v3264_v6 = vmul.f32 0.5, %v2920_v5  ;;  %v2922_v7 = vadd.f32 %v2921_v15, %v2849_v33  ;;  %v2851_v10 = vadd.f32 %v2850_v30, %v6043_v26  ;;  %v2923_v21 = vpop.f32.mrf.mxu1 }
 0x232   : > { %v2852_v11 = vpop.f32.mrf.mxu0 }
 0x233   : > { %4628 = vtanh.f32 %v3264_v6  ;;  %v3265_v12 = vmul.f32 0.5, %v2922_v7  ;;  %v2924_v31 = vadd.f32 %v2923_v21, %v2851_v10  ;;  %v2853_v13 = vadd.f32 %v2852_v11, %v6046_v62  ;;  %v2925_v14 = vpop.f32.mrf.mxu1 }
 0x234   : > { %v2856_v22 = vpop.f32.mrf.mxu0 }
 0x235   : > { %4630 = vtanh.f32 %v3265_v12  ;;  %v3274_v23 = vmul.f32 0.5, %v2924_v31  ;;  %v2926_v28 = vadd.f32 %v2925_v14, %v2853_v13  ;;  %v2857_v29 = vadd.f32 %v2856_v22, %v6043_v26  ;;  %v2929_v34 = vpop.f32.mrf.mxu1 }
 0x236   : > { %v2858_v35 = vpop.f32.mrf.mxu0 }
 0x237   : > { %4632 = vtanh.f32 %v3274_v23  ;;  %v3275_v8 = vmul.f32 0.5, %v2926_v28  ;;  %v2930_v36 = vadd.f32 %v2929_v34, %v2857_v29  ;;  %v2859_v37 = vadd.f32 %v2858_v35, %v6046_v62  ;;  %v2931_v38 = vpop.f32.mrf.mxu1 }
 0x238   : > { %v4621_v41 = vpop.eup %4620  ;;  %v2860_v9 = vpop.f32.mrf.mxu0 }
 0x239   : > { %v3404_v54 = vmul.f32 0.5, %v4621_v41  ;;  %4634 = vtanh.f32 %v3275_v8  ;;  %v3284_v20 = vmul.f32 0.5, %v2930_v36  ;;  %v2932_v56 = vadd.f32 %v2931_v38, %v2859_v37  ;;  %v2933_v18 = vpop.f32.mrf.mxu1 }
 0x23a   : > { %v4623_v42 = vpop.eup %4622  ;;  %v2861_v55 = vadd.f32 %v2860_v9, %v6043_v26  ;;  %v2862_v57 = vpop.f32.mrf.mxu0 }
 0x23b   : > { %v3484_v43 = vadd.f32 0.5, %v3404_v54  ;;  %v3405_v44 = vmul.f32 0.5, %v4623_v42  ;;  %4636 = vtanh.f32 %v3284_v20  ;;  %v3285_v45 = vmul.f32 0.5, %v2932_v56  ;;  %v2935_v46 = vpop.f32.mrf.mxu1 }
 0x23c   : > { %v4625_v47 = vpop.eup %4624  ;;  %v2934_v63 = vadd.f32 %v2933_v18, %v2861_v55  ;;  %v2863_v48 = vadd.f32 %v2862_v57, %v6046_v62  ;;  %v2866_v39 = vpop.f32.mrf.mxu0 }
 0x23d   : > { %3564 = vst [vmem:[%s5840_s10 + $0x20] sm:$0xff] %v3484_v43  ;;  %v3485_v49 = vadd.f32 0.5, %v3405_v44  ;;  %v3414_v50 = vmul.f32 0.5, %v4625_v47  ;;  %4638 = vtanh.f32 %v3285_v45  ;;  %v2867_v40 = vadd.f32 %v2866_v39, %v6043_v26  ;;  %v2939_v52 = vpop.f32.mrf.mxu1 }
 0x23e   : > { %v4627_v58 = vpop.eup %4626  ;;  %v3294_v59 = vmul.f32 0.5, %v2934_v63  ;;  %v2936_v60 = vadd.f32 %v2935_v46, %v2863_v48  ;;  %v2868_v24 = vpop.f32.mrf.mxu0 }
 0x23f   : > { %3565 = vst [vmem:[%s5840_s10 + $0x28] sm:$0xff] %v3485_v49  ;;  %v3494_v61 = vadd.f32 0.5, %v3414_v50  ;;  %v3415_v27 = vmul.f32 0.5, %v4627_v58  ;;  %v2940_v25 = vadd.f32 %v2939_v52, %v2867_v40  ;;  %v2869_v0 = vadd.f32 %v2868_v24, %v6046_v62  ;;  %v2941_v1 = vpop.f32.mrf.mxu1 }
 0x240   : > { %v4629_v51 = vpop.eup %4628  ;;  %4640 = vtanh.f32 %v3294_v59  ;;  %v3295_v2 = vmul.f32 0.5, %v2936_v60  ;;  %v2870_v53 = vpop.f32.mrf.mxu0  ;;  %v886_v52 = vsub.s32 6, %v5014_v16  ;;  %v890_v58 = vsub.s32 7, %v5014_v16  ;;  %v4716_v59 = vld [vmem:[%s6177_s4] sm:$0xff] }
 0x241   : > { %3575 = vst [vmem:[%s5840_s10 + $0x70] sm:$0xff] %v3494_v61  ;;  %v3495_v32 = vadd.f32 0.5, %v3415_v27  ;;  %v3424_v3 = vmul.f32 0.5, %v4629_v51  ;;  %v3304_v4 = vmul.f32 0.5, %v2940_v25  ;;  %v2942_v5 = vadd.f32 %v2941_v1, %v2869_v0  ;;  %v2943_v33 = vpop.f32.mrf.mxu1 }
 0x242   : > { %v4631_v15 = vpop.eup %4630  ;;  %4642 = vtanh.f32 %v3295_v2  ;;  %v2871_v30 = vadd.f32 %v2870_v53, %v6043_v26  ;;  %v2872_v6 = vpop.f32.mrf.mxu0  ;;  %v6085_v60 = vrot.slane %v4716_v59, %v886_v52  ;;  %v6087_v24 = vrot.slane %v4716_v59, %v890_v58 }
 0x243   : > { %3576 = vst [vmem:[%s5840_s10 + $0x78] sm:$0xff] %v3495_v32  ;;  %v3504_v7 = vadd.f32 0.5, %v3424_v3  ;;  %v3425_v10 = vmul.f32 0.5, %v4631_v15  ;;  %4644 = vtanh.f32 %v3304_v4  ;;  %v3305_v21 = vmul.f32 0.5, %v2942_v5  ;;  %v2945_v22 = vpop.f32.mrf.mxu1 }
 0x244   : > { %v4633_v11 = vpop.eup %4632  ;;  %v2944_v12 = vadd.f32 %v2943_v33, %v2871_v30  ;;  %v2873_v31 = vadd.f32 %v2872_v6, %v6046_v62 }
 0x245   : > { %3585 = vst [vmem:[%s5840_s10 + $0xc0] sm:$0xff] %v3504_v7  ;;  %v3505_v13 = vadd.f32 0.5, %v3425_v10  ;;  %v3434_v14 = vmul.f32 0.5, %v4633_v11  ;;  %4646 = vtanh.f32 %v3305_v21 }
 0x246   : > { %v4635_v23 = vpop.eup %4634  ;;  %v3314_v26 = vmul.f32 0.5, %v2944_v12  ;;  %v2946_v28 = vadd.f32 %v2945_v22, %v2873_v31 }
 0x247   : > { %3586 = vst [vmem:[%s5840_s10 + $0xc8] sm:$0xff] %v3505_v13  ;;  %v3514_v29 = vadd.f32 0.5, %v3434_v14  ;;  %v3435_v34 = vmul.f32 0.5, %v4635_v23 }
 0x248   : > { %v4637_v35 = vpop.eup %4636  ;;  %4648 = vtanh.f32 %v3314_v26  ;;  %v3315_v8 = vmul.f32 0.5, %v2946_v28 }
 0x249   : > { %3595 = vst [vmem:[%s5840_s10 + $0x110] sm:$0xff] %v3514_v29  ;;  %v3515_v36 = vadd.f32 0.5, %v3435_v34  ;;  %v3444_v62 = vmul.f32 0.5, %v4637_v35 }
 0x24a   : > { %v4639_v37 = vpop.eup %4638  ;;  %4650 = vtanh.f32 %v3315_v8 }
 0x24b   : > { %3596 = vst [vmem:[%s5840_s10 + $0x118] sm:$0xff] %v3515_v36  ;;  %v3524_v38 = vadd.f32 0.5, %v3444_v62  ;;  %v3445_v41 = vmul.f32 0.5, %v4639_v37 }
 0x24d   : > { %v4641_v9 = vpop.eup %4640  ;;  %3605 = vst [vmem:[%s5840_s10 + $0x160] sm:$0xff] %v3524_v38  ;;  %v3525_v54 = vadd.f32 0.5, %v3445_v41 }
 0x24e   : > { %v3454_v20 = vmul.f32 0.5, %v4641_v9 }
 0x24f   : > { %v4643_v56 = vpop.eup %4642  ;;  %3606 = vst [vmem:[%s5840_s10 + $0x168] sm:$0xff] %v3525_v54 }
 0x250   : > { %v4645_v18 = vpop.eup %4644  ;;  %v3534_v42 = vadd.f32 0.5, %v3454_v20  ;;  %v3455_v55 = vmul.f32 0.5, %v4643_v56 }
 0x251   : > { %v3464_v57 = vmul.f32 0.5, %v4645_v18 }
 0x252   : > { %v4647_v43 = vpop.eup %4646  ;;  %3615 = vst [vmem:[%s5840_s10 + $0x1b0] sm:$0xff] %v3534_v42  ;;  %v3535_v44 = vadd.f32 0.5, %v3455_v55 }
 0x253   : > { %v3544_v45 = vadd.f32 0.5, %v3464_v57  ;;  %v3465_v46 = vmul.f32 0.5, %v4647_v43 }
 0x254   : > { %3616 = vst [vmem:[%s5840_s10 + $0x1b8] sm:$0xff] %v3535_v44 }
 0x255   : > { %v4649_v47 = vpop.eup %4648  ;;  %3625 = vst [vmem:[%s5840_s10 + $0x200] sm:$0xff] %v3544_v45  ;;  %v3545_v63 = vadd.f32 0.5, %v3465_v46 }
 0x256   : > { %v3474_v48 = vmul.f32 0.5, %v4649_v47 }
 0x257   : > { %v4651_v39 = vpop.eup %4650  ;;  %3626 = vst [vmem:[%s5840_s10 + $0x208] sm:$0xff] %v3545_v63 }
 0x258   : > { %v3554_v49 = vadd.f32 0.5, %v3474_v48  ;;  %v3475_v50 = vmul.f32 0.5, %v4651_v39 }
 0x25a   : > { %3635 = vst [vmem:[%s5840_s10 + $0x250] sm:$0xff] %v3554_v49  ;;  %v3555_v40 = vadd.f32 0.5, %v3475_v50 }
 0x25c   : > { %3636 = vst [vmem:[%s5840_s10 + $0x258] sm:$0xff] %v3555_v40 }
 0x265   : > { %v2982_v61 = vpop.f32.mrf.mxu0 }
 0x266   : > { %v2983_v27 = vadd.f32 %v2982_v61, %v6085_v60  ;;  %v3055_v25 = vpop.f32.mrf.mxu1 }
 0x267   : > { %v2984_v0 = vpop.f32.mrf.mxu0 }
 0x268   : > { %v3056_v1 = vadd.f32 %v3055_v25, %v2983_v27  ;;  %v2985_v51 = vadd.f32 %v2984_v0, %v6087_v24  ;;  %v3057_v2 = vpop.f32.mrf.mxu1 }
 0x269   : > { %v2986_v53 = vpop.f32.mrf.mxu0 }
 0x26a   : > { %v3246_v32 = vmul.f32 0.5, %v3056_v1  ;;  %v3058_v16 = vadd.f32 %v3057_v2, %v2985_v51  ;;  %v2987_v3 = vadd.f32 %v2986_v53, %v6085_v60  ;;  %v3059_v4 = vpop.f32.mrf.mxu1 }
 0x26b   : > { %v2988_v5 = vpop.f32.mrf.mxu0 }
 0x26c   : > { %4652 = vtanh.f32 %v3246_v32  ;;  %v3247_v33 = vmul.f32 0.5, %v3058_v16  ;;  %v3060_v15 = vadd.f32 %v3059_v4, %v2987_v3  ;;  %v2989_v30 = vadd.f32 %v2988_v5, %v6087_v24  ;;  %v3061_v6 = vpop.f32.mrf.mxu1 }
 0x26d   : > { %v2992_v7 = vpop.f32.mrf.mxu0 }
 0x26e   : > { %4654 = vtanh.f32 %v3247_v33  ;;  %v3256_v10 = vmul.f32 0.5, %v3060_v15  ;;  %v3062_v21 = vadd.f32 %v3061_v6, %v2989_v30  ;;  %v2993_v11 = vadd.f32 %v2992_v7, %v6085_v60  ;;  %v3065_v12 = vpop.f32.mrf.mxu1 }
 0x26f   : > { %v2994_v31 = vpop.f32.mrf.mxu0 }
 0x270   : > { %4656 = vtanh.f32 %v3256_v10  ;;  %v3257_v13 = vmul.f32 0.5, %v3062_v21  ;;  %v3066_v14 = vadd.f32 %v3065_v12, %v2993_v11  ;;  %v2995_v22 = vadd.f32 %v2994_v31, %v6087_v24  ;;  %v3067_v23 = vpop.f32.mrf.mxu1 }
 0x271   : > { %v2996_v26 = vpop.f32.mrf.mxu0 }
 0x272   : > { %4658 = vtanh.f32 %v3257_v13  ;;  %v3266_v28 = vmul.f32 0.5, %v3066_v14  ;;  %v3068_v29 = vadd.f32 %v3067_v23, %v2995_v22  ;;  %v2997_v34 = vadd.f32 %v2996_v26, %v6085_v60  ;;  %v3069_v35 = vpop.f32.mrf.mxu1 }
 0x273   : > { %v2998_v8 = vpop.f32.mrf.mxu0 }
 0x274   : > { %4660 = vtanh.f32 %v3266_v28  ;;  %v3267_v36 = vmul.f32 0.5, %v3068_v29  ;;  %v3070_v62 = vadd.f32 %v3069_v35, %v2997_v34  ;;  %v2999_v37 = vadd.f32 %v2998_v8, %v6087_v24  ;;  %v3071_v38 = vpop.f32.mrf.mxu1 }
 0x275   : > { %v3002_v41 = vpop.f32.mrf.mxu0 }
 0x276   : > { %4662 = vtanh.f32 %v3267_v36  ;;  %v3276_v9 = vmul.f32 0.5, %v3070_v62  ;;  %v3072_v54 = vadd.f32 %v3071_v38, %v2999_v37  ;;  %v3003_v20 = vadd.f32 %v3002_v41, %v6085_v60  ;;  %v3075_v56 = vpop.f32.mrf.mxu1 }
 0x277   : > { %v3004_v18 = vpop.f32.mrf.mxu0 }
 0x278   : > { %4664 = vtanh.f32 %v3276_v9  ;;  %v3277_v42 = vmul.f32 0.5, %v3072_v54  ;;  %v3076_v55 = vadd.f32 %v3075_v56, %v3003_v20  ;;  %v3005_v57 = vadd.f32 %v3004_v18, %v6087_v24  ;;  %v3077_v43 = vpop.f32.mrf.mxu1 }
 0x279   : > { %v4653_v44 = vpop.eup %4652  ;;  %v3006_v45 = vpop.f32.mrf.mxu0 }
 0x27a   : > { %v3406_v46 = vmul.f32 0.5, %v4653_v44  ;;  %4666 = vtanh.f32 %v3277_v42  ;;  %v3286_v47 = vmul.f32 0.5, %v3076_v55  ;;  %v3078_v63 = vadd.f32 %v3077_v43, %v3005_v57  ;;  %v3079_v48 = vpop.f32.mrf.mxu1 }
 0x27b   : > { %v4655_v39 = vpop.eup %4654  ;;  %v3007_v49 = vadd.f32 %v3006_v45, %v6085_v60  ;;  %v3008_v50 = vpop.f32.mrf.mxu0 }
 0x27c   : > { %v3486_v40 = vadd.f32 0.5, %v3406_v46  ;;  %v3407_v52 = vmul.f32 0.5, %v4655_v39  ;;  %4668 = vtanh.f32 %v3286_v47  ;;  %v3287_v58 = vmul.f32 0.5, %v3078_v63  ;;  %v3081_v59 = vpop.f32.mrf.mxu1 }
 0x27d   : > { %v4657_v61 = vpop.eup %4656  ;;  %v3080_v27 = vadd.f32 %v3079_v48, %v3007_v49  ;;  %v3009_v25 = vadd.f32 %v3008_v50, %v6087_v24  ;;  %v3012_v0 = vpop.f32.mrf.mxu0 }
 0x27e   : > { %3566 = vst [vmem:[%s5840_s10 + $0x30] sm:$0xff] %v3486_v40  ;;  %v3487_v1 = vadd.f32 0.5, %v3407_v52  ;;  %v3416_v51 = vmul.f32 0.5, %v4657_v61  ;;  %4670 = vtanh.f32 %v3287_v58  ;;  %v3013_v2 = vadd.f32 %v3012_v0, %v6085_v60  ;;  %v3085_v53 = vpop.f32.mrf.mxu1 }
 0x27f   : > { %v4659_v32 = vpop.eup %4658  ;;  %v3296_v16 = vmul.f32 0.5, %v3080_v27  ;;  %v3082_v3 = vadd.f32 %v3081_v59, %v3009_v25  ;;  %v3014_v4 = vpop.f32.mrf.mxu0 }
 0x280   : > { %3567 = vst [vmem:[%s5840_s10 + $0x38] sm:$0xff] %v3487_v1  ;;  %v3496_v5 = vadd.f32 0.5, %v3416_v51  ;;  %v3417_v33 = vmul.f32 0.5, %v4659_v32  ;;  %v3086_v15 = vadd.f32 %v3085_v53, %v3013_v2  ;;  %v3015_v30 = vadd.f32 %v3014_v4, %v6087_v24  ;;  %v3087_v6 = vpop.f32.mrf.mxu1  ;;  %v857_v2 = vld [vmem:[%s6177_s4 + $0x8] sm:$0x3] }
 0x281   : > { %v4661_v7 = vpop.eup %4660  ;;  %4672 = vtanh.f32 %v3296_v16  ;;  %v3297_v10 = vmul.f32 0.5, %v3082_v3  ;;  %v3016_v21 = vpop.f32.mrf.mxu0  ;;  %v6125_v53 = vrot.slane %v857_v2, %v5021_v19  ;;  %v6128_v32 = vrot.slane %v857_v2, %v5017_v17 }
 0x282   : > { %3577 = vst [vmem:[%s5840_s10 + $0x80] sm:$0xff] %v3496_v5  ;;  %v3497_v11 = vadd.f32 0.5, %v3417_v33  ;;  %v3426_v12 = vmul.f32 0.5, %v4661_v7  ;;  %v3306_v31 = vmul.f32 0.5, %v3086_v15  ;;  %v3088_v13 = vadd.f32 %v3087_v6, %v3015_v30  ;;  %v3089_v14 = vpop.f32.mrf.mxu1 }
 0x283   : > { %v4663_v22 = vpop.eup %4662  ;;  %4674 = vtanh.f32 %v3297_v10  ;;  %v3017_v23 = vadd.f32 %v3016_v21, %v6085_v60  ;;  %v3018_v26 = vpop.f32.mrf.mxu0 }
 0x284   : > { %3578 = vst [vmem:[%s5840_s10 + $0x88] sm:$0xff] %v3497_v11  ;;  %v3506_v28 = vadd.f32 0.5, %v3426_v12  ;;  %v3427_v29 = vmul.f32 0.5, %v4663_v22  ;;  %4676 = vtanh.f32 %v3306_v31  ;;  %v3307_v34 = vmul.f32 0.5, %v3088_v13  ;;  %v3091_v38 = vpop.f32.mrf.mxu1 }
 0x285   : > { %v4665_v35 = vpop.eup %4664  ;;  %v3090_v8 = vadd.f32 %v3089_v14, %v3017_v23  ;;  %v3019_v36 = vadd.f32 %v3018_v26, %v6087_v24 }
 0x286   : > { %3587 = vst [vmem:[%s5840_s10 + $0xd0] sm:$0xff] %v3506_v28  ;;  %v3507_v62 = vadd.f32 0.5, %v3427_v29  ;;  %v3436_v37 = vmul.f32 0.5, %v4665_v35  ;;  %4678 = vtanh.f32 %v3307_v34 }
 0x287   : > { %v4667_v41 = vpop.eup %4666  ;;  %v3316_v60 = vmul.f32 0.5, %v3090_v8  ;;  %v3092_v9 = vadd.f32 %v3091_v38, %v3019_v36 }
 0x288   : > { %3588 = vst [vmem:[%s5840_s10 + $0xd8] sm:$0xff] %v3507_v62  ;;  %v3516_v54 = vadd.f32 0.5, %v3436_v37  ;;  %v3437_v20 = vmul.f32 0.5, %v4667_v41 }
 0x289   : > { %v4669_v56 = vpop.eup %4668  ;;  %4680 = vtanh.f32 %v3316_v60  ;;  %v3317_v18 = vmul.f32 0.5, %v3092_v9 }
 0x28a   : > { %3597 = vst [vmem:[%s5840_s10 + $0x120] sm:$0xff] %v3516_v54  ;;  %v3517_v42 = vadd.f32 0.5, %v3437_v20  ;;  %v3446_v24 = vmul.f32 0.5, %v4669_v56 }
 0x28b   : > { %v4671_v55 = vpop.eup %4670  ;;  %4682 = vtanh.f32 %v3317_v18 }
 0x28c   : > { %3598 = vst [vmem:[%s5840_s10 + $0x128] sm:$0xff] %v3517_v42  ;;  %v3526_v57 = vadd.f32 0.5, %v3446_v24  ;;  %v3447_v43 = vmul.f32 0.5, %v4671_v55 }
 0x28e   : > { %v4673_v44 = vpop.eup %4672  ;;  %3607 = vst [vmem:[%s5840_s10 + $0x170] sm:$0xff] %v3526_v57  ;;  %v3527_v45 = vadd.f32 0.5, %v3447_v43 }
 0x28f   : > { %v3456_v46 = vmul.f32 0.5, %v4673_v44 }
 0x290   : > { %v4675_v47 = vpop.eup %4674  ;;  %3608 = vst [vmem:[%s5840_s10 + $0x178] sm:$0xff] %v3527_v45 }
 0x291   : > { %v4677_v63 = vpop.eup %4676  ;;  %v3536_v48 = vadd.f32 0.5, %v3456_v46  ;;  %v3457_v39 = vmul.f32 0.5, %v4675_v47 }
 0x292   : > { %v3466_v49 = vmul.f32 0.5, %v4677_v63 }
 0x293   : > { %v4679_v50 = vpop.eup %4678  ;;  %3617 = vst [vmem:[%s5840_s10 + $0x1c0] sm:$0xff] %v3536_v48  ;;  %v3537_v40 = vadd.f32 0.5, %v3457_v39 }
 0x294   : > { %v3546_v52 = vadd.f32 0.5, %v3466_v49  ;;  %v3467_v58 = vmul.f32 0.5, %v4679_v50 }
 0x295   : > { %3618 = vst [vmem:[%s5840_s10 + $0x1c8] sm:$0xff] %v3537_v40 }
 0x296   : > { %v4681_v59 = vpop.eup %4680  ;;  %3627 = vst [vmem:[%s5840_s10 + $0x210] sm:$0xff] %v3546_v52  ;;  %v3547_v61 = vadd.f32 0.5, %v3467_v58 }
 0x297   : > { %v3476_v27 = vmul.f32 0.5, %v4681_v59 }
 0x298   : > { %v4683_v25 = vpop.eup %4682  ;;  %3628 = vst [vmem:[%s5840_s10 + $0x218] sm:$0xff] %v3547_v61 }
 0x299   : > { %v3556_v0 = vadd.f32 0.5, %v3476_v27  ;;  %v3477_v1 = vmul.f32 0.5, %v4683_v25 }
 0x29b   : > { %3637 = vst [vmem:[%s5840_s10 + $0x260] sm:$0xff] %v3556_v0  ;;  %v3557_v51 = vadd.f32 0.5, %v3477_v1 }
 0x29d   : > { %3638 = vst [vmem:[%s5840_s10 + $0x268] sm:$0xff] %v3557_v51 }
 0x2a6   : > { %v3128_v16 = vpop.f32.mrf.mxu0 }
 0x2a7   : > { %v3129_v3 = vadd.f32 %v3128_v16, %v6125_v53  ;;  %v3201_v4 = vpop.f32.mrf.mxu1 }
 0x2a8   : > { %v3130_v5 = vpop.f32.mrf.mxu0 }
 0x2a9   : > { %v3202_v33 = vadd.f32 %v3201_v4, %v3129_v3  ;;  %v3131_v15 = vadd.f32 %v3130_v5, %v6128_v32  ;;  %v3203_v30 = vpop.f32.mrf.mxu1 }
 0x2aa   : > { %v3132_v6 = vpop.f32.mrf.mxu0 }
 0x2ab   : > { %v3248_v7 = vmul.f32 0.5, %v3202_v33  ;;  %v3204_v10 = vadd.f32 %v3203_v30, %v3131_v15  ;;  %v3133_v21 = vadd.f32 %v3132_v6, %v6125_v53  ;;  %v3205_v11 = vpop.f32.mrf.mxu1 }
 0x2ac   : > { %v3134_v19 = vpop.f32.mrf.mxu0 }
 0x2ad   : > { %4684 = vtanh.f32 %v3248_v7  ;;  %v3249_v12 = vmul.f32 0.5, %v3204_v10  ;;  %v3206_v17 = vadd.f32 %v3205_v11, %v3133_v21  ;;  %v3135_v31 = vadd.f32 %v3134_v19, %v6128_v32  ;;  %v3207_v13 = vpop.f32.mrf.mxu1 }
 0x2ae   : > { %v3138_v14 = vpop.f32.mrf.mxu0 }
 0x2af   : > { %4686 = vtanh.f32 %v3249_v12  ;;  %v3258_v22 = vmul.f32 0.5, %v3206_v17  ;;  %v3208_v23 = vadd.f32 %v3207_v13, %v3135_v31  ;;  %v3139_v26 = vadd.f32 %v3138_v14, %v6125_v53  ;;  %v3211_v28 = vpop.f32.mrf.mxu1 }
 0x2b0   : > { %v3140_v29 = vpop.f32.mrf.mxu0 }
 0x2b1   : > { %4688 = vtanh.f32 %v3258_v22  ;;  %v3259_v34 = vmul.f32 0.5, %v3208_v23  ;;  %v3212_v35 = vadd.f32 %v3211_v28, %v3139_v26  ;;  %v3141_v8 = vadd.f32 %v3140_v29, %v6128_v32  ;;  %v3213_v36 = vpop.f32.mrf.mxu1 }
 0x2b2   : > { %v3142_v62 = vpop.f32.mrf.mxu0 }
 0x2b3   : > { %4690 = vtanh.f32 %v3259_v34  ;;  %v3268_v37 = vmul.f32 0.5, %v3212_v35  ;;  %v3214_v38 = vadd.f32 %v3213_v36, %v3141_v8  ;;  %v3143_v41 = vadd.f32 %v3142_v62, %v6125_v53  ;;  %v3215_v60 = vpop.f32.mrf.mxu1 }
 0x2b4   : > { %v3144_v9 = vpop.f32.mrf.mxu0 }
 0x2b5   : > { %4692 = vtanh.f32 %v3268_v37  ;;  %v3269_v54 = vmul.f32 0.5, %v3214_v38  ;;  %v3216_v20 = vadd.f32 %v3215_v60, %v3143_v41  ;;  %v3145_v56 = vadd.f32 %v3144_v9, %v6128_v32  ;;  %v3217_v18 = vpop.f32.mrf.mxu1 }
 0x2b6   : > { %v3148_v42 = vpop.f32.mrf.mxu0 }
 0x2b7   : > { %4694 = vtanh.f32 %v3269_v54  ;;  %v3278_v24 = vmul.f32 0.5, %v3216_v20  ;;  %v3218_v55 = vadd.f32 %v3217_v18, %v3145_v56  ;;  %v3149_v57 = vadd.f32 %v3148_v42, %v6125_v53  ;;  %v3221_v43 = vpop.f32.mrf.mxu1 }
 0x2b8   : > { %v3150_v44 = vpop.f32.mrf.mxu0 }
 0x2b9   : > { %4696 = vtanh.f32 %v3278_v24  ;;  %v3279_v45 = vmul.f32 0.5, %v3218_v55  ;;  %v3222_v46 = vadd.f32 %v3221_v43, %v3149_v57  ;;  %v3151_v47 = vadd.f32 %v3150_v44, %v6128_v32  ;;  %v3223_v63 = vpop.f32.mrf.mxu1 }
 0x2ba   : > { %v4685_v48 = vpop.eup %4684  ;;  %v3152_v39 = vpop.f32.mrf.mxu0 }
 0x2bb   : > { %v3408_v49 = vmul.f32 0.5, %v4685_v48  ;;  %4698 = vtanh.f32 %v3279_v45  ;;  %v3288_v50 = vmul.f32 0.5, %v3222_v46  ;;  %v3224_v40 = vadd.f32 %v3223_v63, %v3151_v47  ;;  %v3225_v52 = vpop.f32.mrf.mxu1 }
 0x2bc   : > { %v4687_v58 = vpop.eup %4686  ;;  %v3153_v59 = vadd.f32 %v3152_v39, %v6125_v53  ;;  %v3154_v61 = vpop.f32.mrf.mxu0 }
 0x2bd   : > { %v3488_v27 = vadd.f32 0.5, %v3408_v49  ;;  %v3409_v25 = vmul.f32 0.5, %v4687_v58  ;;  %4700 = vtanh.f32 %v3288_v50  ;;  %v3289_v0 = vmul.f32 0.5, %v3224_v40  ;;  %v3227_v1 = vpop.f32.mrf.mxu1 }
 0x2be   : > { %v4689_v51 = vpop.eup %4688  ;;  %v3226_v2 = vadd.f32 %v3225_v52, %v3153_v59  ;;  %v3155_v16 = vadd.f32 %v3154_v61, %v6128_v32  ;;  %v3158_v3 = vpop.f32.mrf.mxu0 }
 0x2bf   : > { %3568 = vst [vmem:[%s5840_s10 + $0x40] sm:$0xff] %v3488_v27  ;;  %v3489_v4 = vadd.f32 0.5, %v3409_v25  ;;  %v3418_v5 = vmul.f32 0.5, %v4689_v51  ;;  %4702 = vtanh.f32 %v3289_v0  ;;  %v3159_v33 = vadd.f32 %v3158_v3, %v6125_v53  ;;  %v3231_v15 = vpop.f32.mrf.mxu1 }
 0x2c0   : > { %v4691_v30 = vpop.eup %4690  ;;  %v3298_v6 = vmul.f32 0.5, %v3226_v2  ;;  %v3228_v7 = vadd.f32 %v3227_v1, %v3155_v16  ;;  %v3160_v10 = vpop.f32.mrf.mxu0 }
 0x2c1   : > { %3570 = vst.msk [vmem:[%s5840_s10 + $0x48] sm:$0xff] %vm3569_vm1, %v3489_v4  ;;  %v3498_v21 = vadd.f32 0.5, %v3418_v5  ;;  %v3419_v11 = vmul.f32 0.5, %v4691_v30  ;;  %v3232_v19 = vadd.f32 %v3231_v15, %v3159_v33  ;;  %v3161_v12 = vadd.f32 %v3160_v10, %v6128_v32  ;;  %v3233_v17 = vpop.f32.mrf.mxu1 }
 0x2c2   : > { %v4693_v31 = vpop.eup %4692  ;;  %4704 = vtanh.f32 %v3298_v6  ;;  %v3299_v13 = vmul.f32 0.5, %v3228_v7  ;;  %v3162_v14 = vpop.f32.mrf.mxu0 }
 0x2c3   : > { %3579 = vst [vmem:[%s5840_s10 + $0x90] sm:$0xff] %v3498_v21  ;;  %v3499_v22 = vadd.f32 0.5, %v3419_v11  ;;  %v3428_v23 = vmul.f32 0.5, %v4693_v31  ;;  %v3308_v26 = vmul.f32 0.5, %v3232_v19  ;;  %v3234_v28 = vadd.f32 %v3233_v17, %v3161_v12  ;;  %v3235_v29 = vpop.f32.mrf.mxu1 }
 0x2c4   : > { %v4695_v34 = vpop.eup %4694  ;;  %4706 = vtanh.f32 %v3299_v13  ;;  %v3163_v35 = vadd.f32 %v3162_v14, %v6125_v53  ;;  %v3164_v8 = vpop.f32.mrf.mxu0 }
 0x2c5   : > { %3580 = vst.msk [vmem:[%s5840_s10 + $0x98] sm:$0xff] %vm3569_vm1, %v3499_v22  ;;  %v3508_v36 = vadd.f32 0.5, %v3428_v23  ;;  %v3429_v62 = vmul.f32 0.5, %v4695_v34  ;;  %4708 = vtanh.f32 %v3308_v26  ;;  %v3309_v37 = vmul.f32 0.5, %v3234_v28  ;;  %v3237_v20 = vpop.f32.mrf.mxu1 }
 0x2c6   : > { %v4697_v38 = vpop.eup %4696  ;;  %v3236_v41 = vadd.f32 %v3235_v29, %v3163_v35  ;;  %v3165_v60 = vadd.f32 %v3164_v8, %v6128_v32 }
 0x2c7   : > { %3589 = vst [vmem:[%s5840_s10 + $0xe0] sm:$0xff] %v3508_v36  ;;  %v3509_v9 = vadd.f32 0.5, %v3429_v62  ;;  %v3438_v54 = vmul.f32 0.5, %v4697_v38  ;;  %4710 = vtanh.f32 %v3309_v37 }
 0x2c8   : > { %v4699_v53 = vpop.eup %4698  ;;  %v3318_v56 = vmul.f32 0.5, %v3236_v41  ;;  %v3238_v18 = vadd.f32 %v3237_v20, %v3165_v60 }
 0x2c9   : > { %3590 = vst.msk [vmem:[%s5840_s10 + $0xe8] sm:$0xff] %vm3569_vm1, %v3509_v9  ;;  %v3518_v42 = vadd.f32 0.5, %v3438_v54  ;;  %v3439_v24 = vmul.f32 0.5, %v4699_v53 }
 0x2ca   : > { %v4701_v55 = vpop.eup %4700  ;;  %4712 = vtanh.f32 %v3318_v56  ;;  %v3319_v57 = vmul.f32 0.5, %v3238_v18 }
 0x2cb   : > { %3599 = vst [vmem:[%s5840_s10 + $0x130] sm:$0xff] %v3518_v42  ;;  %v3519_v32 = vadd.f32 0.5, %v3439_v24  ;;  %v3448_v43 = vmul.f32 0.5, %v4701_v55 }
 0x2cc   : > { %v4703_v44 = vpop.eup %4702  ;;  %4714 = vtanh.f32 %v3319_v57 }
 0x2cd   : > { %3600 = vst.msk [vmem:[%s5840_s10 + $0x138] sm:$0xff] %vm3569_vm1, %v3519_v32  ;;  %v3528_v45 = vadd.f32 0.5, %v3448_v43  ;;  %v3449_v46 = vmul.f32 0.5, %v4703_v44 }
 0x2cf   : > { %v4705_v47 = vpop.eup %4704  ;;  %3609 = vst [vmem:[%s5840_s10 + $0x180] sm:$0xff] %v3528_v45  ;;  %v3529_v63 = vadd.f32 0.5, %v3449_v46 }
 0x2d0   : > { %v3458_v48 = vmul.f32 0.5, %v4705_v47 }
 0x2d1   : > { %v4707_v39 = vpop.eup %4706  ;;  %3610 = vst.msk [vmem:[%s5840_s10 + $0x188] sm:$0xff] %vm3569_vm1, %v3529_v63 }
 0x2d2   : > { %v4709_v49 = vpop.eup %4708  ;;  %v3538_v50 = vadd.f32 0.5, %v3458_v48  ;;  %v3459_v40 = vmul.f32 0.5, %v4707_v39 }
 0x2d3   : > { %v3468_v52 = vmul.f32 0.5, %v4709_v49 }
 0x2d4   : > { %v4711_v58 = vpop.eup %4710  ;;  %3619 = vst [vmem:[%s5840_s10 + $0x1d0] sm:$0xff] %v3538_v50  ;;  %v3539_v59 = vadd.f32 0.5, %v3459_v40 }
 0x2d5   : > { %v3548_v61 = vadd.f32 0.5, %v3468_v52  ;;  %v3469_v27 = vmul.f32 0.5, %v4711_v58 }
 0x2d6   : > { %3620 = vst.msk [vmem:[%s5840_s10 + $0x1d8] sm:$0xff] %vm3569_vm1, %v3539_v59 }
 0x2d7   : > { %v4713_v25 = vpop.eup %4712  ;;  %3629 = vst [vmem:[%s5840_s10 + $0x220] sm:$0xff] %v3548_v61  ;;  %v3549_v0 = vadd.f32 0.5, %v3469_v27 }
 0x2d8   : > { %v3478_v1 = vmul.f32 0.5, %v4713_v25 }
 0x2d9   : > { %v4715_v51 = vpop.eup %4714  ;;  %3630 = vst.msk [vmem:[%s5840_s10 + $0x228] sm:$0xff] %vm3569_vm1, %v3549_v0 }
 0x2da   : > { %v3558_v2 = vadd.f32 0.5, %v3478_v1  ;;  %v3479_v16 = vmul.f32 0.5, %v4715_v51 }
 0x2dc   : > { %3639 = vst [vmem:[%s5840_s10 + $0x270] sm:$0xff] %v3558_v2  ;;  %v3559_v3 = vadd.f32 0.5, %v3479_v16 }
 0x2de   : > { %3640 = vst.msk [vmem:[%s5840_s10 + $0x278] sm:$0xff] %vm3569_vm1, %v3559_v3 }
 0x2df PF: > { %s15_s18 = sadd.s32 1, %s4723_s18  }
 0x2e0   : > { %p12_p4 = scmp.ge.s32.totalorder %s15_s18, 4  }
 0x2e2   :  { %14 = sbr.rel (!%p12_p4) target bundleno = 1 (0x1), region = 70 }

</bundles_post_ra>
